<compile_context>
chip_gen: v5e
topology: v5e:2x2
jax: 0.10.0
libtpu: 0.0.40
codegen_flags: <defaults>
</compile_context>

<pallas_src>
import jax
import jax.numpy as jnp
from jax import lax
from jax.experimental import pallas as pl
from jax.experimental.pallas import tpu as pltpu


NCLS = 10


# ------------------------------- fused kernel -------------------------------

def _fused_cnn_kernel(x_ref, m1_ref, b1_ref, m2_ref, b2_ref, wfc_ref, bfc_ref,
                      o_ref):
    f32 = jnp.float32
    b = x_ref.shape[2]                               # batch tile (multiple of 8)
    xin = x_ref[0]                                   # (30, B, 32): zero pad rows at h=-1, h=28

    # conv1: 3 band matmuls (one per kh tap), stacked along M = 28*B.
    a1 = jnp.dot(xin[0:28].reshape(28 * b, 32), m1_ref[0], preferred_element_type=f32)
    a1 = a1 + jnp.dot(xin[1:29].reshape(28 * b, 32), m1_ref[1], preferred_element_type=f32)
    a1 = a1 + jnp.dot(xin[2:30].reshape(28 * b, 32), m1_ref[2], preferred_element_type=f32)
    a1 = jnp.maximum(a1 + b1_ref[...], 0.0)          # (28B, 256), lane = (w%2)*128 + c*16 + w//2

    # maxpool 2x2: rows = adjacent h-blocks; columns = opposite 128-lane halves.
    a1 = a1.reshape(14, 2, b, 256)
    v1 = jnp.maximum(a1[:, 0], a1[:, 1])             # (14, B, 256)
    pool1 = jnp.maximum(v1[:, :, :128], v1[:, :, 128:])   # (14, B, 128), lane = c*16 + w'

    # conv2: zero-pad the h axis with one block above/below, 3 band matmuls.
    zpad = jnp.zeros((1, b, 128), f32)
    p1 = jnp.concatenate([zpad, pool1, zpad], axis=0)      # (16, B, 128)
    a2 = jnp.dot(p1[0:14].reshape(14 * b, 128), m2_ref[0], preferred_element_type=f32)
    a2 = a2 + jnp.dot(p1[1:15].reshape(14 * b, 128), m2_ref[1], preferred_element_type=f32)
    a2 = a2 + jnp.dot(p1[2:16].reshape(14 * b, 128), m2_ref[2], preferred_element_type=f32)
    a2 = jnp.maximum(a2 + b2_ref[...], 0.0)          # (14B, 256), lane = (w%2)*128 + c*8 + w//2

    # maxpool 2x2 again.
    a2 = a2.reshape(7, 2, b, 256)
    v2 = jnp.maximum(a2[:, 0], a2[:, 1])             # (7, B, 256)
    pool2 = jnp.maximum(v2[:, :, :128], v2[:, :, 128:])    # (7, B, 128), lane = c*8 + w''

    # fc: 7 accumulated (B,128)@(128,128) MXU matmuls; NCHW flatten + class
    # padding (10 -> 128) already folded into wfc_ref.
    acc = jnp.dot(pool2[0], wfc_ref[0], preferred_element_type=f32)
    for h in range(1, 7):
        acc = acc + jnp.dot(pool2[h], wfc_ref[h], preferred_element_type=f32)
    o_ref[...] = acc + bfc_ref[...]                  # dense (B, 128) store


# --------------------------- parameter preparation --------------------------

def prepare_params(params):
    """One-time transform of PyTorch-layout params into kernel-ready layouts."""
    f32 = jnp.float32
    hi = lax.Precision.HIGHEST

    # conv1 band matrices: (3, 32, 256)
    #   input lane  = raw column u (28 real, padded to 32)
    #   output lane = (w%2)*128 + c*16 + (w//2)   (w//2 padded 14 -> 16)
    w1 = params["w1"].astype(f32)                                  # (8,1,3,3)
    idx = jnp.arange(28)
    sel1 = (idx[None, :, None] ==
            idx[None, None, :] + jnp.arange(3)[:, None, None] - 1).astype(f32)  # (3,28,28)
    t1 = jnp.einsum("okx,xuw->kuow", w1[:, 0], sel1, precision=hi)  # (3,28,8,28)
    t1 = jnp.pad(t1, ((0, 0), (0, 4), (0, 0), (0, 0)))              # u: 28->32
    t1 = t1.reshape(3, 32, 8, 14, 2)                                # w -> (q, p)
    t1 = t1.transpose(0, 1, 4, 2, 3)                                # (kh, u, p, c, q)
    t1 = jnp.pad(t1, ((0, 0), (0, 0), (0, 0), (0, 0), (0, 2)))      # q: 14->16
    m1 = t1.reshape(3, 32, 256)

    # conv2 band matrices: (3, 128, 256)
    #   input lane  = ci*16 + u'   (u' padded 14 -> 16)
    #   output lane = (w'%2)*128 + co*8 + (w'//2)   (w'//2 padded 7 -> 8)
    w2 = params["w2"].astype(f32)                                   # (16,8,3,3)
    idx2 = jnp.arange(14)
    sel2 = (idx2[None, :, None] ==
            idx2[None, None, :] + jnp.arange(3)[:, None, None] - 1).astype(f32)  # (3,14,14)
    t2 = jnp.einsum("oikx,xuw->kiuow", w2, sel2, precision=hi)      # (3,8,14,16,14)
    t2 = jnp.pad(t2, ((0, 0), (0, 0), (0, 2), (0, 0), (0, 0)))      # u': 14->16
    t2 = t2.reshape(3, 8, 16, 16, 7, 2)                             # w' -> (q, p)
    t2 = t2.transpose(0, 1, 2, 5, 3, 4)                             # (kh, ci, u, p, co, q)
    t2 = jnp.pad(t2, ((0, 0), (0, 0), (0, 0), (0, 0), (0, 0), (0, 1)))  # q: 7->8
    m2 = t2.reshape(3, 128, 256)

    # biases mapped onto the permuted conv-output lanes (zeros in padded cols).
    b1 = params["b1"].astype(f32)
    b1h = jnp.where(jnp.arange(16)[None, :] < 14, b1[:, None], 0.0).reshape(-1)  # (128,)
    b1f = jnp.concatenate([b1h, b1h]).reshape(1, 256)
    b2 = params["b2"].astype(f32)
    b2h = jnp.where(jnp.arange(8)[None, :] < 7, b2[:, None], 0.0).reshape(-1)    # (128,)
    b2f = jnp.concatenate([b2h, b2h]).reshape(1, 256)

    # fc weight: (7, 128, 128); row = c*8 + w (pool2 lane), col = class (10 -> 128).
    wfc = params["wfc"].astype(f32).reshape(NCLS, 16, 7, 7)         # (k, c, h, w)
    wfc = wfc.transpose(2, 1, 3, 0)                                 # (h, c, w, k)
    wfc = jnp.pad(wfc, ((0, 0), (0, 0), (0, 1), (0, 128 - NCLS)))   # w:7->8, k:10->128
    wfcr = wfc.reshape(7, 128, 128)
    bfcf = jnp.pad(params["bfc"].astype(f32), (0, 128 - NCLS)).reshape(1, 128)

    return {"m1": m1, "b1": b1f, "m2": m2, "b2": b2f, "wfc": wfcr, "bfc": bfcf}


# --------------------------------- forward ----------------------------------

def _pick_batch_tile(n):
    if n >= 32:
        return 32
    return max(8, ((n + 7) // 8) * 8)


@jax.jit
def cnn_forward(kparams, x_nchw):
    n = x_nchw.shape[0]
    bt = _pick_batch_tile(n)
    npad = ((n + bt - 1) // bt) * bt
    g = npad // bt

    x = jnp.pad(x_nchw.astype(jnp.float32),
                ((0, npad - n), (0, 0), (0, 0), (0, 0)))
    # (G, 30, B, 32): h-major rows, one zero row above/below each image,
    # raw columns padded 28 -> 32.  Cheap one-shot XLA relayout on HBM.
    xp = jnp.pad(x[:, 0], ((0, 0), (1, 1), (0, 4)))                 # (npad, 30, 32)
    xin = xp.reshape(g, bt, 30, 32).transpose(0, 2, 1, 3)           # (G, 30, B, 32)

    out = pl.pallas_call(
        _fused_cnn_kernel,
        out_shape=jax.ShapeDtypeStruct((npad, 128), jnp.float32),
        grid_spec=pltpu.PrefetchScalarGridSpec(
            num_scalar_prefetch=0,
            grid=(g,),
            in_specs=[
                pl.BlockSpec((1, 30, bt, 32), lambda i: (i, 0, 0, 0)),   # batch tile
                pl.BlockSpec((3, 32, 256), lambda i: (0, 0, 0)),         # conv1 bands
                pl.BlockSpec((1, 256), lambda i: (0, 0)),                # b1
                pl.BlockSpec((3, 128, 256), lambda i: (0, 0, 0)),        # conv2 bands
                pl.BlockSpec((1, 256), lambda i: (0, 0)),                # b2
                pl.BlockSpec((7, 128, 128), lambda i: (0, 0, 0)),        # fc weight
                pl.BlockSpec((1, 128), lambda i: (0, 0)),                # fc bias
            ],
            out_specs=pl.BlockSpec((bt, 128), lambda i: (i, 0)),
        ),
        compiler_params=pltpu.CompilerParams(
            dimension_semantics=("parallel",)),
    )(xin, kparams["m1"], kparams["b1"], kparams["m2"], kparams["b2"],
      kparams["wfc"], kparams["bfc"])
    return out[:n, :NCLS]


# ------------------------------ init & reference ----------------------------

def init_params(key):
    k = jax.random.split(key, 6)
    return {
        "w1": jax.random.normal(k[0], (8, 1, 3, 3), jnp.float32) * 0.1,
        "b1": jax.random.normal(k[1], (8,), jnp.float32) * 0.01,
        "w2": jax.random.normal(k[2], (16, 8, 3, 3), jnp.float32) * 0.1,
        "b2": jax.random.normal(k[3], (16,), jnp.float32) * 0.01,
        "wfc": jax.random.normal(k[4], (NCLS, 16 * 7 * 7), jnp.float32) * 0.05,
        "bfc": jax.random.normal(k[5], (NCLS,), jnp.float32) * 0.01,
    }


def cnn_reference(params, x_nchw):
    hi = lax.Precision.HIGHEST

    def conv(x, w, b):
        y = lax.conv_general_dilated(
            x, w, (1, 1), "SAME",
            dimension_numbers=("NCHW", "OIHW", "NCHW"), precision=hi)
        return jax.nn.relu(y + b.reshape(1, -1, 1, 1))

    def pool(x):
        return lax.reduce_window(x, -jnp.inf, lax.max,
                                 (1, 1, 2, 2), (1, 1, 2, 2), "VALID")

    x = pool(conv(x_nchw, params["w1"], params["b1"]))
    x = pool(conv(x, params["w2"], params["b2"]))
    x = x.reshape(x.shape[0], -1)
    return jnp.dot(x, params["wfc"].T, precision=hi) + params["bfc"]


if __name__ == "__main__":
    key = jax.random.PRNGKey(0)
    pkey, xkey, xkey2 = jax.random.split(key, 3)
    params = init_params(pkey)
    kparams = prepare_params(params)           # one-time weight re-layout

    # MNIST-like input implied by the 16*7*7 fc: (batch, 1, 28, 28), NCHW.
    x = jax.random.normal(xkey, (2, 1, 28, 28), jnp.float32)
    out = jax.block_until_ready(cnn_forward(kparams, x))
    ref = jax.block_until_ready(cnn_reference(params, x))
    assert out.shape == (2, NCLS) and out.dtype == jnp.float32
    assert jnp.allclose(out, ref, rtol=2e-3, atol=2e-3), "mismatch vs reference (n=2)"

    # Larger batch exercising the multi-step ("parallel") batch-tiled grid.
    xl = jax.random.normal(xkey2, (80, 1, 28, 28), jnp.float32)
    outl = jax.block_until_ready(cnn_forward(kparams, xl))
    refl = jax.block_until_ready(cnn_reference(params, xl))
    assert outl.shape == (80, NCLS)
    assert jnp.allclose(outl, refl, rtol=2e-3, atol=2e-3), "mismatch vs reference (n=80)"

    print("KERNEL_OK")
</pallas_src>

<mosaic_0001>
module attributes {stable_mosaic.version = 11 : i64} {
  func.func @_fused_cnn_kernel(%arg0: i32, %arg1: memref<1x30x8x32xf32, #tpu.memory_space<vmem>>, %arg2: memref<3x32x256xf32, #tpu.memory_space<vmem>>, %arg3: memref<1x256xf32, #tpu.memory_space<vmem>>, %arg4: memref<3x128x256xf32, #tpu.memory_space<vmem>>, %arg5: memref<1x256xf32, #tpu.memory_space<vmem>>, %arg6: memref<7x128x128xf32, #tpu.memory_space<vmem>>, %arg7: memref<1x128xf32, #tpu.memory_space<vmem>>, %arg8: memref<8x128xf32, #tpu.memory_space<vmem>>) attributes {dimension_semantics = [#tpu.dimension_semantics<parallel>], iteration_bounds = array<i64: 1>, scalar_prefetch = 0 : i64, scratch_operands = 0 : i64, tpu.core_type = #tpu.core_type<tc>, window_params = [{transform_indices = @transform_0, window_bounds = array<i64: 1, 30, 8, 32>}, {pipeline_mode = #tpu.pipeline_mode<synchronous>, transform_indices = @transform_1, window_bounds = array<i64: 3, 32, 256>}, {pipeline_mode = #tpu.pipeline_mode<synchronous>, transform_indices = @transform_2, window_bounds = array<i64: 1, 256>}, {pipeline_mode = #tpu.pipeline_mode<synchronous>, transform_indices = @transform_3, window_bounds = array<i64: 3, 128, 256>}, {pipeline_mode = #tpu.pipeline_mode<synchronous>, transform_indices = @transform_4, window_bounds = array<i64: 1, 256>}, {pipeline_mode = #tpu.pipeline_mode<synchronous>, transform_indices = @transform_5, window_bounds = array<i64: 7, 128, 128>}, {pipeline_mode = #tpu.pipeline_mode<synchronous>, transform_indices = @transform_6, window_bounds = array<i64: 1, 128>}, {transform_indices = @transform_7, window_bounds = array<i64: 8, 128>}]} {
    %c0 = arith.constant 0 : index
    %c0_0 = arith.constant 0 : index
    %c0_1 = arith.constant 0 : index
    %c0_2 = arith.constant 0 : index
    %0 = vector.load %arg1[%c0, %c0_0, %c0_1, %c0_2] : memref<1x30x8x32xf32, #tpu.memory_space<vmem>>, vector<1x30x8x32xf32>
    %1 = vector.shape_cast %0 : vector<1x30x8x32xf32> to vector<30x8x32xf32>
    %2 = vector.extract_strided_slice %1 {offsets = [0, 0, 0], sizes = [28, 8, 32], strides = [1, 1, 1]} : vector<30x8x32xf32> to vector<28x8x32xf32>
    %3 = vector.shape_cast %2 : vector<28x8x32xf32> to vector<224x32xf32>
    %c0_3 = arith.constant 0 : index
    %c0_4 = arith.constant 0 : index
    %c0_5 = arith.constant 0 : index
    %4 = vector.load %arg2[%c0_3, %c0_4, %c0_5] : memref<3x32x256xf32, #tpu.memory_space<vmem>>, vector<1x32x256xf32>
    %5 = vector.shape_cast %4 : vector<1x32x256xf32> to vector<32x256xf32>
    %cst = arith.constant dense<0.000000e+00> : vector<224x256xf32>
    %6 = tpu.matmul %3, %5, %cst {dimension_numbers = #tpu.dot_dimension_numbers<[1], [0], [0], [1], [0, 0, 1, 1], [], []>} : vector<224x32xf32>, vector<32x256xf32>, vector<224x256xf32> -> vector<224x256xf32>
    %7 = vector.extract_strided_slice %1 {offsets = [1, 0, 0], sizes = [28, 8, 32], strides = [1, 1, 1]} : vector<30x8x32xf32> to vector<28x8x32xf32>
    %8 = vector.shape_cast %7 : vector<28x8x32xf32> to vector<224x32xf32>
    %c1 = arith.constant 1 : index
    %c0_6 = arith.constant 0 : index
    %c0_7 = arith.constant 0 : index
    %9 = vector.load %arg2[%c1, %c0_6, %c0_7] : memref<3x32x256xf32, #tpu.memory_space<vmem>>, vector<1x32x256xf32>
    %10 = vector.shape_cast %9 : vector<1x32x256xf32> to vector<32x256xf32>
    %cst_8 = arith.constant dense<0.000000e+00> : vector<224x256xf32>
    %11 = tpu.matmul %8, %10, %cst_8 {dimension_numbers = #tpu.dot_dimension_numbers<[1], [0], [0], [1], [0, 0, 1, 1], [], []>} : vector<224x32xf32>, vector<32x256xf32>, vector<224x256xf32> -> vector<224x256xf32>
    %12 = arith.addf %6, %11 : vector<224x256xf32>
    %13 = vector.extract_strided_slice %1 {offsets = [2, 0, 0], sizes = [28, 8, 32], strides = [1, 1, 1]} : vector<30x8x32xf32> to vector<28x8x32xf32>
    %14 = vector.shape_cast %13 : vector<28x8x32xf32> to vector<224x32xf32>
    %c2 = arith.constant 2 : index
    %c0_9 = arith.constant 0 : index
    %c0_10 = arith.constant 0 : index
    %15 = vector.load %arg2[%c2, %c0_9, %c0_10] : memref<3x32x256xf32, #tpu.memory_space<vmem>>, vector<1x32x256xf32>
    %16 = vector.shape_cast %15 : vector<1x32x256xf32> to vector<32x256xf32>
    %cst_11 = arith.constant dense<0.000000e+00> : vector<224x256xf32>
    %17 = tpu.matmul %14, %16, %cst_11 {dimension_numbers = #tpu.dot_dimension_numbers<[1], [0], [0], [1], [0, 0, 1, 1], [], []>} : vector<224x32xf32>, vector<32x256xf32>, vector<224x256xf32> -> vector<224x256xf32>
    %18 = arith.addf %12, %17 : vector<224x256xf32>
    %c0_12 = arith.constant 0 : index
    %c0_13 = arith.constant 0 : index
    %19 = vector.load %arg3[%c0_12, %c0_13] : memref<1x256xf32, #tpu.memory_space<vmem>>, vector<1x256xf32>
    %20 = vector.broadcast %19 : vector<1x256xf32> to vector<224x256xf32>
    %21 = arith.addf %18, %20 : vector<224x256xf32>
    %cst_14 = arith.constant 0.000000e+00 : f32
    %22 = vector.broadcast %cst_14 : f32 to vector<224x256xf32>
    %23 = arith.maximumf %21, %22 : vector<224x256xf32>
    %24 = vector.shape_cast %23 : vector<224x256xf32> to vector<14x2x8x256xf32>
    %25 = vector.extract_strided_slice %24 {offsets = [0, 0, 0, 0], sizes = [14, 1, 8, 256], strides = [1, 1, 1, 1]} : vector<14x2x8x256xf32> to vector<14x1x8x256xf32>
    %26 = vector.shape_cast %25 : vector<14x1x8x256xf32> to vector<14x8x256xf32>
    %27 = vector.extract_strided_slice %24 {offsets = [0, 1, 0, 0], sizes = [14, 1, 8, 256], strides = [1, 1, 1, 1]} : vector<14x2x8x256xf32> to vector<14x1x8x256xf32>
    %28 = vector.shape_cast %27 : vector<14x1x8x256xf32> to vector<14x8x256xf32>
    %29 = arith.maximumf %26, %28 : vector<14x8x256xf32>
    %30 = vector.extract_strided_slice %29 {offsets = [0, 0, 0], sizes = [14, 8, 128], strides = [1, 1, 1]} : vector<14x8x256xf32> to vector<14x8x128xf32>
    %31 = vector.extract_strided_slice %29 {offsets = [0, 0, 128], sizes = [14, 8, 128], strides = [1, 1, 1]} : vector<14x8x256xf32> to vector<14x8x128xf32>
    %32 = arith.maximumf %30, %31 : vector<14x8x128xf32>
    %cst_15 = arith.constant 0.000000e+00 : f32
    %33 = vector.broadcast %cst_15 : f32 to vector<1x8x128xf32>
    %34 = tpu.concatenate %33, %32, %33 in 0 : vector<1x8x128xf32>, vector<14x8x128xf32>, vector<1x8x128xf32> -> vector<16x8x128xf32>
    %35 = vector.extract_strided_slice %34 {offsets = [0, 0, 0], sizes = [14, 8, 128], strides = [1, 1, 1]} : vector<16x8x128xf32> to vector<14x8x128xf32>
    %36 = vector.shape_cast %35 : vector<14x8x128xf32> to vector<112x128xf32>
    %c0_16 = arith.constant 0 : index
    %c0_17 = arith.constant 0 : index
    %c0_18 = arith.constant 0 : index
    %37 = vector.load %arg4[%c0_16, %c0_17, %c0_18] : memref<3x128x256xf32, #tpu.memory_space<vmem>>, vector<1x128x256xf32>
    %38 = vector.shape_cast %37 : vector<1x128x256xf32> to vector<128x256xf32>
    %cst_19 = arith.constant dense<0.000000e+00> : vector<112x256xf32>
    %39 = tpu.matmul %36, %38, %cst_19 {dimension_numbers = #tpu.dot_dimension_numbers<[1], [0], [0], [1], [0, 0, 1, 1], [], []>} : vector<112x128xf32>, vector<128x256xf32>, vector<112x256xf32> -> vector<112x256xf32>
    %40 = vector.extract_strided_slice %34 {offsets = [1, 0, 0], sizes = [14, 8, 128], strides = [1, 1, 1]} : vector<16x8x128xf32> to vector<14x8x128xf32>
    %41 = vector.shape_cast %40 : vector<14x8x128xf32> to vector<112x128xf32>
    %c1_20 = arith.constant 1 : index
    %c0_21 = arith.constant 0 : index
    %c0_22 = arith.constant 0 : index
    %42 = vector.load %arg4[%c1_20, %c0_21, %c0_22] : memref<3x128x256xf32, #tpu.memory_space<vmem>>, vector<1x128x256xf32>
    %43 = vector.shape_cast %42 : vector<1x128x256xf32> to vector<128x256xf32>
    %cst_23 = arith.constant dense<0.000000e+00> : vector<112x256xf32>
    %44 = tpu.matmul %41, %43, %cst_23 {dimension_numbers = #tpu.dot_dimension_numbers<[1], [0], [0], [1], [0, 0, 1, 1], [], []>} : vector<112x128xf32>, vector<128x256xf32>, vector<112x256xf32> -> vector<112x256xf32>
    %45 = arith.addf %39, %44 : vector<112x256xf32>
    %46 = vector.extract_strided_slice %34 {offsets = [2, 0, 0], sizes = [14, 8, 128], strides = [1, 1, 1]} : vector<16x8x128xf32> to vector<14x8x128xf32>
    %47 = vector.shape_cast %46 : vector<14x8x128xf32> to vector<112x128xf32>
    %c2_24 = arith.constant 2 : index
    %c0_25 = arith.constant 0 : index
    %c0_26 = arith.constant 0 : index
    %48 = vector.load %arg4[%c2_24, %c0_25, %c0_26] : memref<3x128x256xf32, #tpu.memory_space<vmem>>, vector<1x128x256xf32>
    %49 = vector.shape_cast %48 : vector<1x128x256xf32> to vector<128x256xf32>
    %cst_27 = arith.constant dense<0.000000e+00> : vector<112x256xf32>
    %50 = tpu.matmul %47, %49, %cst_27 {dimension_numbers = #tpu.dot_dimension_numbers<[1], [0], [0], [1], [0, 0, 1, 1], [], []>} : vector<112x128xf32>, vector<128x256xf32>, vector<112x256xf32> -> vector<112x256xf32>
    %51 = arith.addf %45, %50 : vector<112x256xf32>
    %c0_28 = arith.constant 0 : index
    %c0_29 = arith.constant 0 : index
    %52 = vector.load %arg5[%c0_28, %c0_29] : memref<1x256xf32, #tpu.memory_space<vmem>>, vector<1x256xf32>
    %53 = vector.broadcast %52 : vector<1x256xf32> to vector<112x256xf32>
    %54 = arith.addf %51, %53 : vector<112x256xf32>
    %cst_30 = arith.constant 0.000000e+00 : f32
    %55 = vector.broadcast %cst_30 : f32 to vector<112x256xf32>
    %56 = arith.maximumf %54, %55 : vector<112x256xf32>
    %57 = vector.shape_cast %56 : vector<112x256xf32> to vector<7x2x8x256xf32>
    %58 = vector.extract_strided_slice %57 {offsets = [0, 0, 0, 0], sizes = [7, 1, 8, 256], strides = [1, 1, 1, 1]} : vector<7x2x8x256xf32> to vector<7x1x8x256xf32>
    %59 = vector.shape_cast %58 : vector<7x1x8x256xf32> to vector<7x8x256xf32>
    %60 = vector.extract_strided_slice %57 {offsets = [0, 1, 0, 0], sizes = [7, 1, 8, 256], strides = [1, 1, 1, 1]} : vector<7x2x8x256xf32> to vector<7x1x8x256xf32>
    %61 = vector.shape_cast %60 : vector<7x1x8x256xf32> to vector<7x8x256xf32>
    %62 = arith.maximumf %59, %61 : vector<7x8x256xf32>
    %63 = vector.extract_strided_slice %62 {offsets = [0, 0, 0], sizes = [7, 8, 128], strides = [1, 1, 1]} : vector<7x8x256xf32> to vector<7x8x128xf32>
    %64 = vector.extract_strided_slice %62 {offsets = [0, 0, 128], sizes = [7, 8, 128], strides = [1, 1, 1]} : vector<7x8x256xf32> to vector<7x8x128xf32>
    %65 = arith.maximumf %63, %64 : vector<7x8x128xf32>
    %66 = vector.extract_strided_slice %65 {offsets = [0, 0, 0], sizes = [1, 8, 128], strides = [1, 1, 1]} : vector<7x8x128xf32> to vector<1x8x128xf32>
    %67 = vector.shape_cast %66 : vector<1x8x128xf32> to vector<8x128xf32>
    %c0_31 = arith.constant 0 : index
    %c0_32 = arith.constant 0 : index
    %c0_33 = arith.constant 0 : index
    %68 = vector.load %arg6[%c0_31, %c0_32, %c0_33] : memref<7x128x128xf32, #tpu.memory_space<vmem>>, vector<1x128x128xf32>
    %69 = vector.shape_cast %68 : vector<1x128x128xf32> to vector<128x128xf32>
    %cst_34 = arith.constant dense<0.000000e+00> : vector<8x128xf32>
    %70 = tpu.matmul %67, %69, %cst_34 {dimension_numbers = #tpu.dot_dimension_numbers<[1], [0], [0], [1], [0, 0, 1, 1], [], []>} : vector<8x128xf32>, vector<128x128xf32>, vector<8x128xf32> -> vector<8x128xf32>
    %71 = vector.extract_strided_slice %65 {offsets = [1, 0, 0], sizes = [1, 8, 128], strides = [1, 1, 1]} : vector<7x8x128xf32> to vector<1x8x128xf32>
    %72 = vector.shape_cast %71 : vector<1x8x128xf32> to vector<8x128xf32>
    %c1_35 = arith.constant 1 : index
    %c0_36 = arith.constant 0 : index
    %c0_37 = arith.constant 0 : index
    %73 = vector.load %arg6[%c1_35, %c0_36, %c0_37] : memref<7x128x128xf32, #tpu.memory_space<vmem>>, vector<1x128x128xf32>
    %74 = vector.shape_cast %73 : vector<1x128x128xf32> to vector<128x128xf32>
    %cst_38 = arith.constant dense<0.000000e+00> : vector<8x128xf32>
    %75 = tpu.matmul %72, %74, %cst_38 {dimension_numbers = #tpu.dot_dimension_numbers<[1], [0], [0], [1], [0, 0, 1, 1], [], []>} : vector<8x128xf32>, vector<128x128xf32>, vector<8x128xf32> -> vector<8x128xf32>
    %76 = arith.addf %70, %75 : vector<8x128xf32>
    %77 = vector.extract_strided_slice %65 {offsets = [2, 0, 0], sizes = [1, 8, 128], strides = [1, 1, 1]} : vector<7x8x128xf32> to vector<1x8x128xf32>
    %78 = vector.shape_cast %77 : vector<1x8x128xf32> to vector<8x128xf32>
    %c2_39 = arith.constant 2 : index
    %c0_40 = arith.constant 0 : index
    %c0_41 = arith.constant 0 : index
    %79 = vector.load %arg6[%c2_39, %c0_40, %c0_41] : memref<7x128x128xf32, #tpu.memory_space<vmem>>, vector<1x128x128xf32>
    %80 = vector.shape_cast %79 : vector<1x128x128xf32> to vector<128x128xf32>
    %cst_42 = arith.constant dense<0.000000e+00> : vector<8x128xf32>
    %81 = tpu.matmul %78, %80, %cst_42 {dimension_numbers = #tpu.dot_dimension_numbers<[1], [0], [0], [1], [0, 0, 1, 1], [], []>} : vector<8x128xf32>, vector<128x128xf32>, vector<8x128xf32> -> vector<8x128xf32>
    %82 = arith.addf %76, %81 : vector<8x128xf32>
    %83 = vector.extract_strided_slice %65 {offsets = [3, 0, 0], sizes = [1, 8, 128], strides = [1, 1, 1]} : vector<7x8x128xf32> to vector<1x8x128xf32>
    %84 = vector.shape_cast %83 : vector<1x8x128xf32> to vector<8x128xf32>
    %c3 = arith.constant 3 : index
    %c0_43 = arith.constant 0 : index
    %c0_44 = arith.constant 0 : index
    %85 = vector.load %arg6[%c3, %c0_43, %c0_44] : memref<7x128x128xf32, #tpu.memory_space<vmem>>, vector<1x128x128xf32>
    %86 = vector.shape_cast %85 : vector<1x128x128xf32> to vector<128x128xf32>
    %cst_45 = arith.constant dense<0.000000e+00> : vector<8x128xf32>
    %87 = tpu.matmul %84, %86, %cst_45 {dimension_numbers = #tpu.dot_dimension_numbers<[1], [0], [0], [1], [0, 0, 1, 1], [], []>} : vector<8x128xf32>, vector<128x128xf32>, vector<8x128xf32> -> vector<8x128xf32>
    %88 = arith.addf %82, %87 : vector<8x128xf32>
    %89 = vector.extract_strided_slice %65 {offsets = [4, 0, 0], sizes = [1, 8, 128], strides = [1, 1, 1]} : vector<7x8x128xf32> to vector<1x8x128xf32>
    %90 = vector.shape_cast %89 : vector<1x8x128xf32> to vector<8x128xf32>
    %c4 = arith.constant 4 : index
    %c0_46 = arith.constant 0 : index
    %c0_47 = arith.constant 0 : index
    %91 = vector.load %arg6[%c4, %c0_46, %c0_47] : memref<7x128x128xf32, #tpu.memory_space<vmem>>, vector<1x128x128xf32>
    %92 = vector.shape_cast %91 : vector<1x128x128xf32> to vector<128x128xf32>
    %cst_48 = arith.constant dense<0.000000e+00> : vector<8x128xf32>
    %93 = tpu.matmul %90, %92, %cst_48 {dimension_numbers = #tpu.dot_dimension_numbers<[1], [0], [0], [1], [0, 0, 1, 1], [], []>} : vector<8x128xf32>, vector<128x128xf32>, vector<8x128xf32> -> vector<8x128xf32>
    %94 = arith.addf %88, %93 : vector<8x128xf32>
    %95 = vector.extract_strided_slice %65 {offsets = [5, 0, 0], sizes = [1, 8, 128], strides = [1, 1, 1]} : vector<7x8x128xf32> to vector<1x8x128xf32>
    %96 = vector.shape_cast %95 : vector<1x8x128xf32> to vector<8x128xf32>
    %c5 = arith.constant 5 : index
    %c0_49 = arith.constant 0 : index
    %c0_50 = arith.constant 0 : index
    %97 = vector.load %arg6[%c5, %c0_49, %c0_50] : memref<7x128x128xf32, #tpu.memory_space<vmem>>, vector<1x128x128xf32>
    %98 = vector.shape_cast %97 : vector<1x128x128xf32> to vector<128x128xf32>
    %cst_51 = arith.constant dense<0.000000e+00> : vector<8x128xf32>
    %99 = tpu.matmul %96, %98, %cst_51 {dimension_numbers = #tpu.dot_dimension_numbers<[1], [0], [0], [1], [0, 0, 1, 1], [], []>} : vector<8x128xf32>, vector<128x128xf32>, vector<8x128xf32> -> vector<8x128xf32>
    %100 = arith.addf %94, %99 : vector<8x128xf32>
    %101 = vector.extract_strided_slice %65 {offsets = [6, 0, 0], sizes = [1, 8, 128], strides = [1, 1, 1]} : vector<7x8x128xf32> to vector<1x8x128xf32>
    %102 = vector.shape_cast %101 : vector<1x8x128xf32> to vector<8x128xf32>
    %c6 = arith.constant 6 : index
    %c0_52 = arith.constant 0 : index
    %c0_53 = arith.constant 0 : index
    %103 = vector.load %arg6[%c6, %c0_52, %c0_53] : memref<7x128x128xf32, #tpu.memory_space<vmem>>, vector<1x128x128xf32>
    %104 = vector.shape_cast %103 : vector<1x128x128xf32> to vector<128x128xf32>
    %cst_54 = arith.constant dense<0.000000e+00> : vector<8x128xf32>
    %105 = tpu.matmul %102, %104, %cst_54 {dimension_numbers = #tpu.dot_dimension_numbers<[1], [0], [0], [1], [0, 0, 1, 1], [], []>} : vector<8x128xf32>, vector<128x128xf32>, vector<8x128xf32> -> vector<8x128xf32>
    %106 = arith.addf %100, %105 : vector<8x128xf32>
    %c0_55 = arith.constant 0 : index
    %c0_56 = arith.constant 0 : index
    %107 = vector.load %arg7[%c0_55, %c0_56] : memref<1x128xf32, #tpu.memory_space<vmem>>, vector<1x128xf32>
    %108 = vector.broadcast %107 : vector<1x128xf32> to vector<8x128xf32>
    %109 = arith.addf %106, %108 : vector<8x128xf32>
    %c0_57 = arith.constant 0 : index
    %c0_58 = arith.constant 0 : index
    %110 = vector.load %arg8[%c0_57, %c0_58] : memref<8x128xf32, #tpu.memory_space<vmem>>, vector<8x128xf32>
    tpu.vector_store %arg8[%c0_57, %c0_58], %109 {strides = array<i32>} : memref<8x128xf32, #tpu.memory_space<vmem>>, vector<8x128xf32>,
    return
  }
  func.func @transform_0(%arg0: i32) -> (i32, i32, i32, i32) {
    %c0_i32 = arith.constant 0 : i32
    %c0_i32_0 = arith.constant 0 : i32
    %c0_i32_1 = arith.constant 0 : i32
    %c0_i32_2 = arith.constant 0 : i32
    return %arg0, %c0_i32, %c0_i32_0, %c0_i32_1 : i32, i32, i32, i32
  }
  func.func @transform_1(%arg0: i32) -> (i32, i32, i32) {
    %c0_i32 = arith.constant 0 : i32
    %c0_i32_0 = arith.constant 0 : i32
    %c0_i32_1 = arith.constant 0 : i32
    %c0_i32_2 = arith.constant 0 : i32
    return %c0_i32, %c0_i32_0, %c0_i32_1 : i32, i32, i32
  }
  func.func @transform_2(%arg0: i32) -> (i32, i32) {
    %c0_i32 = arith.constant 0 : i32
    %c0_i32_0 = arith.constant 0 : i32
    %c0_i32_1 = arith.constant 0 : i32
    return %c0_i32, %c0_i32_0 : i32, i32
  }
  func.func @transform_3(%arg0: i32) -> (i32, i32, i32) {
    %c0_i32 = arith.constant 0 : i32
    %c0_i32_0 = arith.constant 0 : i32
    %c0_i32_1 = arith.constant 0 : i32
    %c0_i32_2 = arith.constant 0 : i32
    return %c0_i32, %c0_i32_0, %c0_i32_1 : i32, i32, i32
  }
  func.func @transform_4(%arg0: i32) -> (i32, i32) {
    %c0_i32 = arith.constant 0 : i32
    %c0_i32_0 = arith.constant 0 : i32
    %c0_i32_1 = arith.constant 0 : i32
    return %c0_i32, %c0_i32_0 : i32, i32
  }
  func.func @transform_5(%arg0: i32) -> (i32, i32, i32) {
    %c0_i32 = arith.constant 0 : i32
    %c0_i32_0 = arith.constant 0 : i32
    %c0_i32_1 = arith.constant 0 : i32
    %c0_i32_2 = arith.constant 0 : i32
    return %c0_i32, %c0_i32_0, %c0_i32_1 : i32, i32, i32
  }
  func.func @transform_6(%arg0: i32) -> (i32, i32) {
    %c0_i32 = arith.constant 0 : i32
    %c0_i32_0 = arith.constant 0 : i32
    %c0_i32_1 = arith.constant 0 : i32
    return %c0_i32, %c0_i32_0 : i32, i32
  }
  func.func @transform_7(%arg0: i32) -> (i32, i32) {
    %c0_i32 = arith.constant 0 : i32
    %c0_i32_0 = arith.constant 0 : i32
    return %arg0, %c0_i32 : i32, i32
  }
}

</mosaic_0001>

<bundles_post_ra>
// kernel: cnn_forward.1
= control target key start
LH: loop header
LB: loop body
LE: loop exit
PB: predicated region body
PF: predicated region fallthrough
CT: control target
= control target key end

     0   :  { %12 = vsyncpa [#allocation3], 0  ;;  %s3530_s0 = inlined_call_operand.vmem [shape: f32[1,30,8,32], index: 0, kind: input, shape index: {}]   ;;  %s3531_s1 = inlined_call_operand.hbm [shape: f32[3,32,256], index: 1, kind: input, shape index: {}]   ;;  %s3532_s2 = inlined_call_operand.vmem [shape: f32[1,256], index: 2, kind: input, shape index: {}]   ;;  %s3533_s3 = inlined_call_operand.vmem [shape: f32[3,128,256], index: 3, kind: input, shape index: {}]   ;;  %s3534_s4 = inlined_call_operand.vmem [shape: f32[1,256], index: 4, kind: input, shape index: {}]   ;;  %s3535_s5 = inlined_call_operand.hbm [shape: f32[7,128,128], index: 5, kind: input, shape index: {}]   ;;  %s3536_s6 = inlined_call_operand.vmem [shape: f32[1,128], index: 6, kind: input, shape index: {}]   ;;  %s3537_s7 = inlined_call_operand.vmem [shape: f32[8,128], index: 7, kind: output, shape index: {}]  }
   0x1   :  { %s20_s26 = sshll.u32 %s3531_s1, 4  ;;  %s21_s26 = int_to_ptr.hbm [resolvable:$true] %s20_s26 }
   0x2   :  { %13 = vsyncpa [#allocation5], 0  ;;  %s2166_s27 = smov [#allocation2]   ;;  %s39_s8 = sshll.u32 %s3535_s5, 4  ;;  %s40_s8 = int_to_ptr.hbm [resolvable:$true] %s39_s8 }
   0x3   :  { %s22_s28 = sshll.u32 %s2166_s27, 4  ;;  %s2167_s9 = smov 256   ;;  %s23_s28 = int_to_ptr.vmem [resolvable:$true] %s22_s28 }
   0x4   :  { %s2168_s10 = smov 16   ;;  %s2169_s11 = smov [#allocation4]  }
   0x5   :  { %28 = dma.hbm_to_vmem [thread:$0]  %s21_s26, 3072, %s23_s28, [#allocation3], %s2167_s9, %s2167_s9, %s2168_s10  }
   0x6   :  { %s41_s12 = sshll.u32 %s2169_s11, 4  ;;  %s2170_s13 = smov 128   ;;  %s42_s12 = int_to_ptr.vmem [resolvable:$true] %s41_s12 }
   0x7   :  { %s2171_s14 = smov 8  }
   0x8   :  { %47 = dma.hbm_to_vmem [thread:$0]  %s40_s8, 14336, %s42_s12, [#allocation5], %s2170_s13, %s2170_s13, %s2171_s14  }
   0x9   :  { %2162 = dma.done.wait [#allocation3], 3072  }
   0xa   :  { %2163 = vsyncadd [#allocation3], 4294964224 }
   0xb   :  { %2164 = dma.done.wait [#allocation5], 14336  }
   0xc   :  { %2165 = vsyncadd [#allocation5], 4294952960  ;;  %v103_v0 = vld [vmem:[#allocation2 + $0x70] sm:$0xff]  ;;  %v104_v1 = vld [vmem:[#allocation2 + $0x78] sm:$0xff]  ;;  %vm105_vm0 = vcmask 261120  }
   0xd   :  { %v94_v2 = vld [vmem:[#allocation2 + $0x30] sm:$0xff]  ;;  %202 = vmatpush.msra.mxu0 %v103_v0  ;;  %2097 = vmatpush.msra.mxu3 %v103_v0  ;;  %v101_v3 = vld [vmem:[#allocation2 + $0x60] sm:$0xff]  ;;  %v102_v4 = vld [vmem:[#allocation2 + $0x68] sm:$0xff] }
   0xe   :  { %v92_v5 = vld [vmem:[#allocation2 + $0x20] sm:$0xff]  ;;  %303 = vmatpush.msra.mxu1 %v104_v1  ;;  %407 = vmatpush.msra.mxu2 %v94_v2  ;;  %v99_v6 = vld [vmem:[#allocation2 + $0x50] sm:$0xff]  ;;  %v100_v7 = vld [vmem:[#allocation2 + $0x58] sm:$0xff] }
   0xf   :  { %203 = vmatpush.msra.mxu0 %v101_v3  ;;  %2098 = vmatpush.msra.mxu3 %v101_v3  ;;  %v90_v8 = vld [vmem:[#allocation2 + $0x10] sm:$0xff]  ;;  %v97_v9 = vld [vmem:[#allocation2 + $0x40] sm:$0xff]  ;;  %v98_v10 = vld [vmem:[#allocation2 + $0x48] sm:$0xff] }
  0x10   :  { %304 = vmatpush.msra.mxu1 %v102_v4  ;;  %408 = vmatpush.msra.mxu2 %v92_v5  ;;  %v88_v11 = vld [vmem:[#allocation2] sm:$0xff]  ;;  %v59_v12 = vld [vmem:[%s3530_s0 + $0x8] sm:$0xff]  ;;  %v604_v15 = vld [vmem:[#allocation2 + $0xb0] sm:$0xff] }
  0x11   :  { %204 = vmatpush.msra.mxu0 %v99_v6  ;;  %2099 = vmatpush.msra.mxu3 %v99_v6  ;;  %v86_v13 = vld [vmem:[%s3530_s0 + $0xe0] sm:$0xff]  ;;  %v605_v16 = vld [vmem:[#allocation2 + $0xb8] sm:$0xff]  ;;  %v2235_v17 = vld [vmem:[%s3530_s0 + $0x10] sm:$0xff] }
  0x12   :  { %305 = vmatpush.msra.mxu1 %v100_v7  ;;  %409 = vmatpush.msra.mxu2 %v90_v8  ;;  %v58_v14 = vld [vmem:[%s3530_s0] sm:$0xff]  ;;  %v95_v18 = vld [vmem:[#allocation2 + $0x38] sm:$0xff]  ;;  %v93_v19 = vld [vmem:[#allocation2 + $0x28] sm:$0xff] }
  0x13   :  { %205 = vmatpush.msra.mxu0 %v97_v9  ;;  %2100 = vmatpush.msra.mxu3 %v97_v9  ;;  %v91_v20 = vld [vmem:[#allocation2 + $0x18] sm:$0xff]  ;;  %v89_v22 = vld [vmem:[#allocation2 + $0x8] sm:$0xff]  ;;  %v602_v23 = vld [vmem:[#allocation2 + $0xa0] sm:$0xff] }
  0x14   :  { %306 = vmatpush.msra.mxu1 %v98_v10  ;;  %410 = vmatpush.msra.mxu2 %v88_v11  ;;  %v2246_v21 = vld [vmem:[%s3530_s0 + $0x18] sm:$0xff]  ;;  %v603_v24 = vld [vmem:[#allocation2 + $0xa8] sm:$0xff]  ;;  %v2258_v25 = vld [vmem:[%s3530_s0 + $0x20] sm:$0xff] }
  0x15   :  { %1865 = vmatmul.msk.f32.vlgmr.msra.gmra.mxu0 %vm105_vm0, %v59_v12  ;;  %1892 = vmatmul.msk.f32.vlgmr.msra.gmra.mxu3 %vm105_vm0, %v86_v13  ;;  %v2270_v26 = vld [vmem:[%s3530_s0 + $0x28] sm:$0xff]  ;;  %v2283_v27 = vld [vmem:[%s3530_s0 + $0x30] sm:$0xff]  ;;  %v2296_v28 = vld [vmem:[%s3530_s0 + $0x38] sm:$0xff] }
  0x16   :  { %1893 = vmatmul.msk.f32.vlgmr.msra.gmra.mxu1 %vm105_vm0, %v59_v12  ;;  %1921 = vmatmul.msk.f32.vlgmr.msra.gmra.mxu2 %vm105_vm0, %v58_v14  ;;  %v2309_v29 = vld [vmem:[%s3530_s0 + $0x40] sm:$0xff]  ;;  %v2322_v30 = vld [vmem:[%s3530_s0 + $0x48] sm:$0xff]  ;;  %v2335_v31 = vld [vmem:[%s3530_s0 + $0x50] sm:$0xff] }
  0x17   :  { %621 = vmatpush.msrb.mxu0 %v604_v15  ;;  %722 = vmatpush.msrb.mxu1 %v605_v16  ;;  %v600_v32 = vld [vmem:[#allocation2 + $0x90] sm:$0xff]  ;;  %v601_v33 = vld [vmem:[#allocation2 + $0x98] sm:$0xff]  ;;  %v2361_v35 = vld [vmem:[%s3530_s0 + $0x60] sm:$0xff] }
  0x18   :  { %2101 = vmatpush.msrb.mxu3 %v104_v1  ;;  %v2348_v34 = vld [vmem:[%s3530_s0 + $0x58] sm:$0xff]  ;;  %v2374_v36 = vld [vmem:[%s3530_s0 + $0x68] sm:$0xff]  ;;  %v2387_v37 = vld [vmem:[%s3530_s0 + $0x70] sm:$0xff] }
  0x19   :  { %622 = vmatpush.msrb.mxu0 %v602_v23  ;;  %723 = vmatpush.msrb.mxu1 %v603_v24  ;;  %v2400_v38 = vld [vmem:[%s3530_s0 + $0x78] sm:$0xff]  ;;  %v2413_v39 = vld [vmem:[%s3530_s0 + $0x80] sm:$0xff]  ;;  %v2426_v41 = vld [vmem:[%s3530_s0 + $0x88] sm:$0xff] }
  0x1a   :  { %2102 = vmatpush.msrb.mxu3 %v102_v4  ;;  %v598_v43 = vld [vmem:[#allocation2 + $0x80] sm:$0xff]  ;;  %v599_v44 = vld [vmem:[#allocation2 + $0x88] sm:$0xff]  ;;  %v2443_v49 = vld [vmem:[%s3530_s0 + $0x90] sm:$0xff] }
  0x1b   :  { %623 = vmatpush.msrb.mxu0 %v600_v32  ;;  %724 = vmatpush.msrb.mxu1 %v601_v33  ;;  %v2458_v53 = vld [vmem:[%s3530_s0 + $0x98] sm:$0xff]  ;;  %v2473_v59 = vld [vmem:[%s3530_s0 + $0xa0] sm:$0xff]  ;;  %v2490_v2 = vld [vmem:[%s3530_s0 + $0xa8] sm:$0xff] }
  0x1c   :  { %2103 = vmatpush.msrb.mxu3 %v100_v7  ;;  %v2511_v8 = vld [vmem:[%s3530_s0 + $0xb0] sm:$0xff] }
  0x1d   :  { %1866 = vmatmul.msk.f32.gmra.mxu0 %vm105_vm0, %v2235_v17  ;;  %725 = vmatpush.msrb.mxu1 %v599_v44  ;;  %v2583_v32 = vld [vmem:[%s3530_s0 + $0xd0] sm:$0xff] }
  0x1e   :  { %2104 = vmatpush.msrb.mxu3 %v98_v10  ;;  %1894 = vmatmul.msk.f32.gmra.mxu1 %vm105_vm0, %v2235_v17 }
  0x1f   :  { %1920 = vmatmul.msk.f32.vlgmr.msrb.gmra.mxu3 %vm105_vm0, %v86_v13  ;;  %1922 = vmatmul.msk.f32.gmra.mxu2 %vm105_vm0, %v59_v12  ;;  %v2530_v13 = vld [vmem:[%s3530_s0 + $0xb8] sm:$0xff] }
  0x20   :  { %508 = vmatpush.msra.mxu3 %v95_v18  ;;  %624 = vmatpush.msrb.mxu0 %v598_v43  ;;  %v2549_v18 = vld [vmem:[%s3530_s0 + $0xc0] sm:$0xff] }
  0x22   :  { %509 = vmatpush.msra.mxu3 %v93_v19 }
  0x24   :  { %510 = vmatpush.msra.mxu3 %v91_v20 }
  0x25   :  { %1867 = vmatmul.msk.f32.gmra.mxu0 %vm105_vm0, %v2246_v21 }
  0x26   :  { %511 = vmatpush.msra.mxu3 %v89_v22  ;;  %1895 = vmatmul.msk.f32.gmra.mxu1 %vm105_vm0, %v2246_v21  ;;  %v2566_v22 = vld [vmem:[%s3530_s0 + $0xc8] sm:$0xff] }
  0x27   :  { %1923 = vmatmul.msk.f32.gmra.mxu2 %vm105_vm0, %v2235_v17  ;;  %1949 = vmatmul.msk.f32.vlgmr.msra.gmra.mxu3 %vm105_vm0, %v58_v14 }
  0x2d   :  { %1868 = vmatmul.msk.f32.gmra.mxu0 %vm105_vm0, %v2258_v25 }
  0x2e   :  { %1896 = vmatmul.msk.f32.gmra.mxu1 %vm105_vm0, %v2258_v25 }
  0x2f   :  { %1924 = vmatmul.msk.f32.gmra.mxu2 %vm105_vm0, %v2246_v21  ;;  %1950 = vmatmul.msk.f32.gmra.mxu3 %vm105_vm0, %v59_v12 }
  0x35   :  { %1869 = vmatmul.msk.f32.gmra.mxu0 %vm105_vm0, %v2270_v26 }
  0x36   :  { %1897 = vmatmul.msk.f32.gmra.mxu1 %vm105_vm0, %v2270_v26 }
  0x37   :  { %1925 = vmatmul.msk.f32.gmra.mxu2 %vm105_vm0, %v2258_v25  ;;  %1951 = vmatmul.msk.f32.gmra.mxu3 %vm105_vm0, %v2235_v17 }
  0x3d   :  { %1870 = vmatmul.msk.f32.gmra.mxu0 %vm105_vm0, %v2283_v27 }
  0x3e   :  { %1898 = vmatmul.msk.f32.gmra.mxu1 %vm105_vm0, %v2283_v27 }
  0x3f   :  { %1926 = vmatmul.msk.f32.gmra.mxu2 %vm105_vm0, %v2270_v26  ;;  %1952 = vmatmul.msk.f32.gmra.mxu3 %vm105_vm0, %v2246_v21 }
  0x45   :  { %1871 = vmatmul.msk.f32.gmra.mxu0 %vm105_vm0, %v2296_v28 }
  0x46   :  { %1899 = vmatmul.msk.f32.gmra.mxu1 %vm105_vm0, %v2296_v28 }
  0x47   :  { %1927 = vmatmul.msk.f32.gmra.mxu2 %vm105_vm0, %v2283_v27  ;;  %1953 = vmatmul.msk.f32.gmra.mxu3 %vm105_vm0, %v2258_v25 }
  0x4d   :  { %1872 = vmatmul.msk.f32.gmra.mxu0 %vm105_vm0, %v2309_v29 }
  0x4e   :  { %1900 = vmatmul.msk.f32.gmra.mxu1 %vm105_vm0, %v2309_v29 }
  0x4f   :  { %1928 = vmatmul.msk.f32.gmra.mxu2 %vm105_vm0, %v2296_v28  ;;  %1954 = vmatmul.msk.f32.gmra.mxu3 %vm105_vm0, %v2270_v26 }
  0x55   :  { %1873 = vmatmul.msk.f32.gmra.mxu0 %vm105_vm0, %v2322_v30 }
  0x56   :  { %1901 = vmatmul.msk.f32.gmra.mxu1 %vm105_vm0, %v2322_v30 }
  0x57   :  { %1929 = vmatmul.msk.f32.gmra.mxu2 %vm105_vm0, %v2309_v29  ;;  %1955 = vmatmul.msk.f32.gmra.mxu3 %vm105_vm0, %v2283_v27 }
  0x5d   :  { %1874 = vmatmul.msk.f32.gmra.mxu0 %vm105_vm0, %v2335_v31 }
  0x5e   :  { %1902 = vmatmul.msk.f32.gmra.mxu1 %vm105_vm0, %v2335_v31 }
  0x5f   :  { %1930 = vmatmul.msk.f32.gmra.mxu2 %vm105_vm0, %v2322_v30  ;;  %1956 = vmatmul.msk.f32.gmra.mxu3 %vm105_vm0, %v2296_v28 }
  0x65   :  { %1875 = vmatmul.msk.f32.gmra.mxu0 %vm105_vm0, %v2348_v34 }
  0x66   :  { %1903 = vmatmul.msk.f32.gmra.mxu1 %vm105_vm0, %v2348_v34 }
  0x67   :  { %1931 = vmatmul.msk.f32.gmra.mxu2 %vm105_vm0, %v2335_v31  ;;  %1957 = vmatmul.msk.f32.gmra.mxu3 %vm105_vm0, %v2309_v29 }
  0x6d   :  { %1876 = vmatmul.msk.f32.gmra.mxu0 %vm105_vm0, %v2361_v35 }
  0x6e   :  { %1904 = vmatmul.msk.f32.gmra.mxu1 %vm105_vm0, %v2361_v35 }
  0x6f   :  { %1932 = vmatmul.msk.f32.gmra.mxu2 %vm105_vm0, %v2348_v34  ;;  %1958 = vmatmul.msk.f32.gmra.mxu3 %vm105_vm0, %v2322_v30 }
  0x75   :  { %1877 = vmatmul.msk.f32.gmra.mxu0 %vm105_vm0, %v2374_v36 }
  0x76   :  { %1905 = vmatmul.msk.f32.gmra.mxu1 %vm105_vm0, %v2374_v36 }
  0x77   :  { %1933 = vmatmul.msk.f32.gmra.mxu2 %vm105_vm0, %v2361_v35  ;;  %1959 = vmatmul.msk.f32.gmra.mxu3 %vm105_vm0, %v2335_v31 }
  0x7d   :  { %1878 = vmatmul.msk.f32.gmra.mxu0 %vm105_vm0, %v2387_v37 }
  0x7e   :  { %1906 = vmatmul.msk.f32.gmra.mxu1 %vm105_vm0, %v2387_v37 }
  0x7f   :  { %1934 = vmatmul.msk.f32.gmra.mxu2 %vm105_vm0, %v2374_v36  ;;  %1960 = vmatmul.msk.f32.gmra.mxu3 %vm105_vm0, %v2348_v34 }
  0x85   :  { %1879 = vmatmul.msk.f32.gmra.mxu0 %vm105_vm0, %v2400_v38 }
  0x86   :  { %1907 = vmatmul.msk.f32.gmra.mxu1 %vm105_vm0, %v2400_v38 }
  0x87   :  { %1935 = vmatmul.msk.f32.gmra.mxu2 %vm105_vm0, %v2387_v37  ;;  %1961 = vmatmul.msk.f32.gmra.mxu3 %vm105_vm0, %v2361_v35 }
  0x8d   :  { %1880 = vmatmul.msk.f32.gmra.mxu0 %vm105_vm0, %v2413_v39 }
  0x8e   :  { %1908 = vmatmul.msk.f32.gmra.mxu1 %vm105_vm0, %v2413_v39 }
  0x8f   :  { %1936 = vmatmul.msk.f32.gmra.mxu2 %vm105_vm0, %v2400_v38  ;;  %1962 = vmatmul.msk.f32.gmra.mxu3 %vm105_vm0, %v2374_v36 }
  0x92   :  { %v207_v40 = vpop.f32.mrf.mxu0 }
  0x93   :  { %v308_v42 = vpop.f32.mrf.mxu1 }
  0x95   :  { %1881 = vmatmul.msk.f32.gmra.mxu0 %vm105_vm0, %v2426_v41 }
  0x96   :  { %1909 = vmatmul.msk.f32.gmra.mxu1 %vm105_vm0, %v2426_v41 }
  0x97   :  { %1937 = vmatmul.msk.f32.gmra.mxu2 %vm105_vm0, %v2413_v39  ;;  %1963 = vmatmul.msk.f32.gmra.mxu3 %vm105_vm0, %v2387_v37 }
  0x98   :  { %v2436_v45 = vpop.f32.mrf.mxu3 }
  0x99   :  { %3538 = vst [vmem:[#allocation8_spill] sm:$0xff] %v2436_v45  ;;  %v412_v46 = vpop.f32.mrf.mxu2 }
  0x9a   :  { %v2438_v47 = vadd.f32 %v412_v46, %v207_v40  ;;  %v210_v48 = vpop.f32.mrf.mxu0  ;;  %v2063_v46 = vld [vmem:[%s3533_s3 + $0x1f0] sm:$0xff] }
  0x9b   :  { %v311_v50 = vpop.f32.mrf.mxu1  ;;  %1092 = vmatpush.msrb.mxu2 %v2063_v46  ;;  %v2058_v46 = vld [vmem:[%s3533_s3 + $0x1c8] sm:$0xff] }
  0x9d   :  { %1882 = vmatmul.msk.f32.gmra.mxu0 %vm105_vm0, %v2443_v49 }
  0x9e   :  { %1910 = vmatmul.msk.f32.gmra.mxu1 %vm105_vm0, %v2443_v49 }
  0x9f   :  { %1938 = vmatmul.msk.f32.gmra.mxu2 %vm105_vm0, %v2426_v41  ;;  %1964 = vmatmul.msk.f32.gmra.mxu3 %vm105_vm0, %v2400_v38 }
  0xa2   :  { %v2453_v51 = vpop.f32.mrf.mxu3  ;;  %v415_v52 = vpop.f32.mrf.mxu2 }
  0xa3   :  { %3539 = vst [vmem:[#allocation9_spill] sm:$0xff] %v2453_v51  ;;  %v2460_v54 = vadd.f32 %v415_v52, %v210_v48  ;;  %v213_v55 = vpop.f32.mrf.mxu0  ;;  %v314_v56 = vpop.f32.mrf.mxu1  ;;  %v2064_v48 = vld [vmem:[%s3533_s3 + $0x1f8] sm:$0xff] }
  0xa4   :  { %1151 = vmatpush.msrb.mxu3 %v2064_v48 }
  0xa5   :  { %1883 = vmatmul.msk.f32.gmra.mxu0 %vm105_vm0, %v2458_v53 }
  0xa6   :  { %1911 = vmatmul.msk.f32.gmra.mxu1 %vm105_vm0, %v2458_v53 }
  0xa7   :  { %1939 = vmatmul.msk.f32.gmra.mxu2 %vm105_vm0, %v2443_v49  ;;  %1965 = vmatmul.msk.f32.gmra.mxu3 %vm105_vm0, %v2413_v39 }
  0xaa   :  { %v418_v57 = vpop.f32.mrf.mxu2  ;;  %v513_v58 = vpop.f32.mrf.mxu3 }
  0xab   :  { %v2475_v60 = vadd.f32 %v418_v57, %v213_v55  ;;  %v2477_v61 = vadd.f32 %v513_v58, %v308_v42  ;;  %v216_v62 = vpop.f32.mrf.mxu0  ;;  %v317_v63 = vpop.f32.mrf.mxu1  ;;  %v2600_v42 = vld [vmem:[%s3530_s0 + $0xd8] sm:$0xff]  ;;  %v2061_v57 = vld [vmem:[%s3533_s3 + $0x1e0] sm:$0xff]  ;;  %v2062_v58 = vld [vmem:[%s3533_s3 + $0x1e8] sm:$0xff] }
  0xac   :  { %1093 = vmatpush.msrb.mxu2 %v2061_v57  ;;  %1152 = vmatpush.msrb.mxu3 %v2062_v58  ;;  %v2055_v58 = vld [vmem:[%s3533_s3 + $0x1b0] sm:$0xff] }
  0xad   :  { %1884 = vmatmul.msk.f32.gmra.mxu0 %vm105_vm0, %v2473_v59 }
  0xae   :  { %1912 = vmatmul.msk.f32.gmra.mxu1 %vm105_vm0, %v2473_v59 }
  0xaf   :  { %1940 = vmatmul.msk.f32.gmra.mxu2 %vm105_vm0, %v2458_v53  ;;  %1966 = vmatmul.msk.f32.gmra.mxu3 %vm105_vm0, %v2426_v41 }
  0xb2   :  { %v421_v0 = vpop.f32.mrf.mxu2  ;;  %v516_v1 = vpop.f32.mrf.mxu3 }
  0xb3   :  { %v2492_v3 = vadd.f32 %v421_v0, %v216_v62  ;;  %v2494_v4 = vadd.f32 %v516_v1, %v311_v50  ;;  %v2496_v5 = vpop.f32.mrf.mxu0  ;;  %v2498_v6 = vpop.f32.mrf.mxu1  ;;  %v2060_v1 = vld [vmem:[%s3533_s3 + $0x1d8] sm:$0xff] }
  0xb4   :  { %1153 = vmatpush.msrb.mxu3 %v2060_v1 }
  0xb5   :  { %1885 = vmatmul.msk.f32.gmra.mxu0 %vm105_vm0, %v2490_v2 }
  0xb6   :  { %1913 = vmatmul.msk.f32.gmra.mxu1 %vm105_vm0, %v2490_v2  ;;  %1154 = vmatpush.msrb.mxu3 %v2058_v46  ;;  %v2053_v46 = vld [vmem:[%s3533_s3 + $0x1a0] sm:$0xff] }
  0xb7   :  { %1941 = vmatmul.msk.f32.gmra.mxu2 %vm105_vm0, %v2473_v59  ;;  %1967 = vmatmul.msk.f32.gmra.mxu3 %vm105_vm0, %v2443_v49 }
  0xba   :  { %v519_v7 = vpop.f32.mrf.mxu3 }
  0xbb   :  { %v2513_v9 = vadd.f32 %v519_v7, %v314_v56  ;;  %v2515_v10 = vpop.f32.mrf.mxu0  ;;  %v2517_v11 = vpop.f32.mrf.mxu1 }
  0xbd   :  { %1886 = vmatmul.msk.f32.gmra.mxu0 %vm105_vm0, %v2511_v8 }
  0xbe   :  { %1914 = vmatmul.msk.f32.gmra.mxu1 %vm105_vm0, %v2511_v8 }
  0xbf   :  { %1942 = vmatmul.msk.f32.gmra.mxu2 %vm105_vm0, %v2490_v2  ;;  %1968 = vmatmul.msk.f32.gmra.mxu3 %vm105_vm0, %v2458_v53 }
  0xc2   :  { %v522_v12 = vpop.f32.mrf.mxu3 }
  0xc3   :  { %v2532_v14 = vadd.f32 %v522_v12, %v317_v63  ;;  %v2534_v15 = vpop.f32.mrf.mxu0  ;;  %v2536_v16 = vpop.f32.mrf.mxu1  ;;  %v2057_v12 = vld [vmem:[%s3533_s3 + $0x1c0] sm:$0xff] }
  0xc5   :  { %1887 = vmatmul.msk.f32.gmra.mxu0 %vm105_vm0, %v2530_v13 }
  0xc6   :  { %1915 = vmatmul.msk.f32.gmra.mxu1 %vm105_vm0, %v2530_v13 }
  0xc7   :  { %1943 = vmatmul.msk.f32.gmra.mxu2 %vm105_vm0, %v2511_v8  ;;  %1969 = vmatmul.msk.f32.gmra.mxu3 %vm105_vm0, %v2473_v59 }
  0xcb   :  { %v2551_v19 = vpop.f32.mrf.mxu0  ;;  %v2553_v20 = vpop.f32.mrf.mxu1 }
  0xcd   :  { %1888 = vmatmul.msk.f32.gmra.mxu0 %vm105_vm0, %v2549_v18 }
  0xce   :  { %1916 = vmatmul.msk.f32.gmra.mxu1 %vm105_vm0, %v2549_v18 }
  0xcf   :  { %1944 = vmatmul.msk.f32.gmra.mxu2 %vm105_vm0, %v2530_v13  ;;  %1970 = vmatmul.msk.f32.gmra.mxu3 %vm105_vm0, %v2490_v2 }
  0xd3   :  { %v2568_v23 = vpop.f32.mrf.mxu0  ;;  %v2570_v24 = vpop.f32.mrf.mxu1 }
  0xd5   :  { %1889 = vmatmul.msk.f32.gmra.mxu0 %vm105_vm0, %v2566_v22 }
  0xd6   :  { %1917 = vmatmul.msk.f32.gmra.mxu1 %vm105_vm0, %v2566_v22 }
  0xd7   :  { %1945 = vmatmul.msk.f32.gmra.mxu2 %vm105_vm0, %v2549_v18  ;;  %1971 = vmatmul.msk.f32.gmra.mxu3 %vm105_vm0, %v2511_v8 }
  0xdb   :  { %v2585_v33 = vpop.f32.mrf.mxu0  ;;  %v2587_v40 = vpop.f32.mrf.mxu1 }
  0xdd   :  { %1890 = vmatmul.msk.f32.gmra.mxu0 %vm105_vm0, %v2583_v32 }
  0xde   :  { %1918 = vmatmul.msk.f32.gmra.mxu1 %vm105_vm0, %v2583_v32 }
  0xdf   :  { %1946 = vmatmul.msk.f32.gmra.mxu2 %vm105_vm0, %v2566_v22  ;;  %1972 = vmatmul.msk.f32.gmra.mxu3 %vm105_vm0, %v2530_v13 }
  0xe3   :  { %v2602_v43 = vpop.f32.mrf.mxu0  ;;  %v2604_v44 = vpop.f32.mrf.mxu1 }
  0xe5   :  { %1891 = vmatmul.msk.f32.gmra.mxu0 %vm105_vm0, %v2600_v42 }
  0xe6   :  { %1919 = vmatmul.msk.f32.gmra.mxu1 %vm105_vm0, %v2600_v42 }
  0xe7   :  { %1947 = vmatmul.msk.f32.gmra.mxu2 %vm105_vm0, %v2583_v32  ;;  %1973 = vmatmul.msk.f32.gmra.mxu3 %vm105_vm0, %v2549_v18 }
  0xeb   :  { %v2620_v50 = vpop.f32.mrf.mxu0  ;;  %v2622_v52 = vpop.f32.mrf.mxu1 }
  0xed   :  { %1977 = vmatmul.msk.f32.vlgmr.msrb.gmra.mxu0 %vm105_vm0, %v2235_v17 }
  0xee   :  { %2005 = vmatmul.msk.f32.vlgmr.msrb.gmra.mxu1 %vm105_vm0, %v2235_v17 }
  0xef   :  { %1948 = vmatmul.msk.f32.gmra.mxu2 %vm105_vm0, %v2600_v42  ;;  %1974 = vmatmul.msk.f32.gmra.mxu3 %vm105_vm0, %v2566_v22 }
  0xf3   :  { %v2632_v55 = vpop.f32.mrf.mxu0  ;;  %v2634_v56 = vpop.f32.mrf.mxu1 }
  0xf5   :  { %1978 = vmatmul.msk.f32.gmra.mxu0 %vm105_vm0, %v2246_v21 }
  0xf6   :  { %2006 = vmatmul.msk.f32.gmra.mxu1 %vm105_vm0, %v2246_v21  ;;  %v2059_v21 = vld [vmem:[%s3533_s3 + $0x1d0] sm:$0xff] }
  0xf7   :  { %1975 = vmatmul.msk.f32.gmra.mxu3 %vm105_vm0, %v2583_v32  ;;  %1094 = vmatpush.msrb.mxu2 %v2059_v21  ;;  %v2056_v21 = vld [vmem:[%s3533_s3 + $0x1b8] sm:$0xff] }
  0xf8   :  { %1155 = vmatpush.msrb.mxu3 %v2056_v21 }
  0xf9   :  { %1095 = vmatpush.msrb.mxu2 %v2057_v12 }
  0xfb   :  { %v2648_v17 = vpop.f32.mrf.mxu0  ;;  %v2650_v62 = vpop.f32.mrf.mxu1  ;;  %1096 = vmatpush.msrb.mxu2 %v2055_v58  ;;  %v2054_v58 = vld [vmem:[%s3533_s3 + $0x1a8] sm:$0xff] }
  0xfc   :  { %1156 = vmatpush.msrb.mxu3 %v2054_v58  ;;  %v2051_v58 = vld [vmem:[%s3533_s3 + $0x190] sm:$0xff] }
  0xfd   :  { %1979 = vmatmul.msk.f32.gmra.mxu0 %vm105_vm0, %v2258_v25  ;;  %1097 = vmatpush.msrb.mxu2 %v2053_v46 }
  0xfe   :  { %2007 = vmatmul.msk.f32.gmra.mxu1 %vm105_vm0, %v2258_v25 }
  0xff   :  { %1976 = vmatmul.msk.f32.gmra.mxu3 %vm105_vm0, %v2600_v42  ;;  %1098 = vmatpush.msrb.mxu2 %v2051_v58  ;;  %v2049_v58 = vld [vmem:[%s3533_s3 + $0x180] sm:$0xff] }
 0x101   :  { %1099 = vmatpush.msrb.mxu2 %v2049_v58  ;;  %v2045_v58 = vld [vmem:[%s3533_s3 + $0x160] sm:$0xff] }
 0x103   :  { %v2658_v63 = vpop.f32.mrf.mxu0  ;;  %v2660_v0 = vpop.f32.mrf.mxu1 }
 0x105   :  { %1980 = vmatmul.msk.f32.gmra.mxu0 %vm105_vm0, %v2270_v26 }
 0x106   :  { %2008 = vmatmul.msk.f32.gmra.mxu1 %vm105_vm0, %v2270_v26 }
 0x10b   :  { %v2672_v25 = vpop.f32.mrf.mxu0  ;;  %v2674_v7 = vpop.f32.mrf.mxu1 }
 0x10d   :  { %1981 = vmatmul.msk.f32.gmra.mxu0 %vm105_vm0, %v2283_v27 }
 0x10e   :  { %2009 = vmatmul.msk.f32.gmra.mxu1 %vm105_vm0, %v2283_v27 }
 0x113   :  { %v2686_v26 = vpop.f32.mrf.mxu0  ;;  %v2688_v48 = vpop.f32.mrf.mxu1 }
 0x114   :  { %3540 = vst [vmem:[#allocation10_spill] sm:$0xff] %v2688_v48  ;;  %v2091_v48 = vld [vmem:[%s3533_s3 + $0x2d0] sm:$0xff] }
 0x115   :  { %1982 = vmatmul.msk.f32.gmra.mxu0 %vm105_vm0, %v2296_v28 }
 0x116   :  { %2010 = vmatmul.msk.f32.gmra.mxu1 %vm105_vm0, %v2296_v28 }
 0x11b   :  { %v2694_v27 = vpop.f32.mrf.mxu0  ;;  %v2696_v57 = vpop.f32.mrf.mxu1 }
 0x11c   :  { %3541 = vst [vmem:[#allocation11_spill] sm:$0xff] %v2694_v27 }
 0x11d   :  { %3542 = vst [vmem:[#allocation12_spill] sm:$0xff] %v2696_v57  ;;  %1983 = vmatmul.msk.f32.gmra.mxu0 %vm105_vm0, %v2309_v29 }
 0x11e   :  { %2011 = vmatmul.msk.f32.gmra.mxu1 %vm105_vm0, %v2309_v29 }
 0x123   :  { %v2708_v28 = vpop.f32.mrf.mxu0  ;;  %v2710_v1 = vpop.f32.mrf.mxu1 }
 0x124   :  { %3543 = vst [vmem:[#allocation13_spill] sm:$0xff] %v2708_v28 }
 0x125   :  { %3544 = vst [vmem:[#allocation14_spill] sm:$0xff] %v2710_v1  ;;  %1984 = vmatmul.msk.f32.gmra.mxu0 %vm105_vm0, %v2322_v30 }
 0x126   :  { %2012 = vmatmul.msk.f32.gmra.mxu1 %vm105_vm0, %v2322_v30 }
 0x12b   :  { %v2716_v29 = vpop.f32.mrf.mxu0  ;;  %v2718_v12 = vpop.f32.mrf.mxu1 }
 0x12c   :  { %3545 = vst [vmem:[#allocation15_spill] sm:$0xff] %v2716_v29 }
 0x12d   :  { %3546 = vst [vmem:[#allocation16_spill] sm:$0xff] %v2718_v12  ;;  %1985 = vmatmul.msk.f32.gmra.mxu0 %vm105_vm0, %v2335_v31  ;;  %v2094_v12 = vld [vmem:[%s3533_s3 + $0x2e8] sm:$0xff] }
 0x12e   :  { %2013 = vmatmul.msk.f32.gmra.mxu1 %vm105_vm0, %v2335_v31  ;;  %v2052_v31 = vld [vmem:[%s3533_s3 + $0x198] sm:$0xff] }
 0x12f   :  { %1157 = vmatpush.msrb.mxu3 %v2052_v31  ;;  %v2050_v31 = vld [vmem:[%s3533_s3 + $0x188] sm:$0xff] }
 0x131   :  { %1158 = vmatpush.msrb.mxu3 %v2050_v31  ;;  %v2046_v31 = vld [vmem:[%s3533_s3 + $0x168] sm:$0xff] }
 0x133   :  { %v2730_v30 = vpop.f32.mrf.mxu0  ;;  %v2732_v21 = vpop.f32.mrf.mxu1 }
 0x134   :  { %3547 = vst [vmem:[#allocation17_spill] sm:$0xff] %v2730_v30  ;;  %v2093_v30 = vld [vmem:[%s3533_s3 + $0x2e0] sm:$0xff] }
 0x135   :  { %3548 = vst [vmem:[#allocation18_spill] sm:$0xff] %v2732_v21  ;;  %1986 = vmatmul.msk.f32.gmra.mxu0 %vm105_vm0, %v2348_v34 }
 0x136   :  { %2014 = vmatmul.msk.f32.gmra.mxu1 %vm105_vm0, %v2348_v34 }
 0x13b   :  { %v2738_v51 = vpop.f32.mrf.mxu0  ;;  %v2740_v46 = vpop.f32.mrf.mxu1 }
 0x13c   :  { %3549 = vst [vmem:[#allocation19_spill] sm:$0xff] %v2738_v51 }
 0x13d   :  { %3550 = vst [vmem:[#allocation20_spill] sm:$0xff] %v2740_v46  ;;  %1987 = vmatmul.msk.f32.gmra.mxu0 %vm105_vm0, %v2361_v35  ;;  %v2035_v46 = vld [vmem:[%s3533_s3 + $0x110] sm:$0xff] }
 0x13e   :  { %2015 = vmatmul.msk.f32.gmra.mxu1 %vm105_vm0, %v2361_v35 }
 0x143   :  { %v2752_v34 = vpop.f32.mrf.mxu0  ;;  %v2754_v45 = vpop.f32.mrf.mxu1 }
 0x144   :  { %3551 = vst [vmem:[#allocation21_spill] sm:$0xff] %v2752_v34 }
 0x145   :  { %3552 = vst [vmem:[#allocation22_spill] sm:$0xff] %v2754_v45  ;;  %1988 = vmatmul.msk.f32.gmra.mxu0 %vm105_vm0, %v2374_v36  ;;  %v2048_v45 = vld [vmem:[%s3533_s3 + $0x178] sm:$0xff] }
 0x146   :  { %2016 = vmatmul.msk.f32.gmra.mxu1 %vm105_vm0, %v2374_v36  ;;  %v2047_v36 = vld [vmem:[%s3533_s3 + $0x170] sm:$0xff]  ;;  %1159 = vmatpush.msrb.mxu3 %v2048_v45  ;;  %v2044_v45 = vld [vmem:[%s3533_s3 + $0x158] sm:$0xff] }
 0x147   :  { %1100 = vmatpush.msrb.mxu2 %v2047_v36  ;;  %v2041_v36 = vld [vmem:[%s3533_s3 + $0x140] sm:$0xff] }
 0x148   :  { %1160 = vmatpush.msrb.mxu3 %v2046_v31  ;;  %v2040_v31 = vld [vmem:[%s3533_s3 + $0x138] sm:$0xff] }
 0x149   :  { %1101 = vmatpush.msrb.mxu2 %v2045_v58  ;;  %v2042_v58 = vld [vmem:[%s3533_s3 + $0x148] sm:$0xff] }
 0x14a   :  { %1161 = vmatpush.msrb.mxu3 %v2044_v45  ;;  %v2812_v45 = vpop.f32.mrf.mxu2 }
 0x14b   :  { %v2766_v35 = vpop.f32.mrf.mxu0  ;;  %v2768_v34 = vpop.f32.mrf.mxu1 }
 0x14c   :  { %3553 = vst [vmem:[#allocation23_spill] sm:$0xff] %v2766_v35  ;;  %v2043_v35 = vld [vmem:[%s3533_s3 + $0x150] sm:$0xff]  ;;  %1162 = vmatpush.msrb.mxu3 %v2042_v58 }
 0x14d   :  { %3554 = vst [vmem:[#allocation24_spill] sm:$0xff] %v2768_v34  ;;  %1989 = vmatmul.msk.f32.gmra.mxu0 %vm105_vm0, %v2387_v37  ;;  %1102 = vmatpush.msrb.mxu2 %v2043_v35  ;;  %v2039_v35 = vld [vmem:[%s3533_s3 + $0x130] sm:$0xff] }
 0x14e   :  { %2017 = vmatmul.msk.f32.gmra.mxu1 %vm105_vm0, %v2387_v37  ;;  %1163 = vmatpush.msrb.mxu3 %v2040_v31  ;;  %v2033_v31 = vld [vmem:[%s3533_s3 + $0x100] sm:$0xff] }
 0x14f   :  { %1103 = vmatpush.msrb.mxu2 %v2041_v36  ;;  %v2038_v36 = vld [vmem:[%s3533_s3 + $0x128] sm:$0xff] }
 0x150   :  { %1164 = vmatpush.msrb.mxu3 %v2038_v36  ;;  %v2096_v36 = vld [vmem:[%s3533_s3 + $0x2f8] sm:$0xff] }
 0x151   :  { %1104 = vmatpush.msrb.mxu2 %v2039_v35  ;;  %v2036_v35 = vld [vmem:[%s3533_s3 + $0x118] sm:$0xff]  ;;  %1420 = vmatpush.msra.mxu1 %v2096_v36  ;;  %v867_v36 = vld [vmem:[%s3532_s2] sm:$0x3] }
 0x152   :  { %1165 = vmatpush.msrb.mxu3 %v2036_v35  ;;  %v2848_v35 = vpop.f32.mrf.mxu2  ;;  %v2875_v21 = vperm.slane %v867_v36, 1 }
 0x153   :  { %v2786_v37 = vpop.f32.mrf.mxu0  ;;  %v2788_v34 = vpop.f32.mrf.mxu1  ;;  %1421 = vmatpush.msra.mxu1 %v2094_v12 }
 0x154   :  { %3555 = vst [vmem:[#allocation25_spill] sm:$0xff] %v2786_v37 }
 0x155   :  { %3556 = vst [vmem:[#allocation26_spill] sm:$0xff] %v2788_v34  ;;  %1990 = vmatmul.msk.f32.gmra.mxu0 %vm105_vm0, %v2400_v38  ;;  %v2814_v34 = vpop.f32.mrf.mxu3 }
 0x156   :  { %2018 = vmatmul.msk.f32.gmra.mxu1 %vm105_vm0, %v2400_v38  ;;  %v2037_v38 = vld [vmem:[%s3533_s3 + $0x120] sm:$0xff] }
 0x157   :  { %1105 = vmatpush.msrb.mxu2 %v2037_v38  ;;  %v2034_v38 = vld [vmem:[%s3533_s3 + $0x108] sm:$0xff] }
 0x158   :  { %1166 = vmatpush.msrb.mxu3 %v2034_v38 }
 0x159   :  { %1106 = vmatpush.msrb.mxu2 %v2035_v46  ;;  %v2095_v46 = vld [vmem:[%s3533_s3 + $0x2f0] sm:$0xff] }
 0x15a   :  { %1361 = vmatpush.msra.mxu0 %v2095_v46  ;;  %v2860_v38 = vpop.f32.mrf.mxu2 }
 0x15b   :  { %v2822_v58 = vpop.f32.mrf.mxu0  ;;  %v2824_v37 = vpop.f32.mrf.mxu1  ;;  %1107 = vmatpush.msrb.mxu2 %v2033_v31 }
 0x15c   :  { %3557 = vst [vmem:[#allocation27_spill] sm:$0xff] %v2822_v58  ;;  %1362 = vmatpush.msra.mxu0 %v2093_v30 }
 0x15d   :  { %3558 = vst [vmem:[#allocation28_spill] sm:$0xff] %v2824_v37  ;;  %1991 = vmatmul.msk.f32.gmra.mxu0 %vm105_vm0, %v2413_v39  ;;  %v2850_v37 = vpop.f32.mrf.mxu3 }
 0x15e   :  { %2019 = vmatmul.msk.f32.gmra.mxu1 %vm105_vm0, %v2413_v39  ;;  %1363 = vmatpush.msra.mxu0 %v2091_v48 }
 0x163   :  { %v2852_v58 = vpop.f32.mrf.mxu0  ;;  %v2854_v51 = vpop.f32.mrf.mxu1 }
 0x164   :  { %3559 = vst [vmem:[#allocation29_spill] sm:$0xff] %v2852_v58  ;;  %v2872_v58 = vperm.slane %v867_v36, 0  ;;  %v2889_v36 = vpop.f32.mrf.mxu2 }
 0x165   :  { %3560 = vst [vmem:[#allocation30_spill] sm:$0xff] %v2854_v51  ;;  %1992 = vmatmul.msk.f32.gmra.mxu0 %vm105_vm0, %v2426_v41  ;;  %v2862_v46 = vpop.f32.mrf.mxu3 }
 0x166   :  { %2020 = vmatmul.msk.f32.gmra.mxu1 %vm105_vm0, %v2426_v41 }
 0x16b   :  { %v626_v39 = vpop.f32.mrf.mxu0  ;;  %v727_v31 = vpop.f32.mrf.mxu1 }
 0x16c   :  { %v811_v51 = vadd.f32 %v626_v39, %v2438_v47  ;;  %v812_v41 = vadd.f32 %v727_v31, %v2477_v61 }
 0x16d   :  { %1993 = vmatmul.msk.f32.gmra.mxu0 %vm105_vm0, %v2443_v49  ;;  %v2891_v1 = vpop.f32.mrf.mxu3 }
 0x16e   :  { %2021 = vmatmul.msk.f32.gmra.mxu1 %vm105_vm0, %v2443_v49  ;;  %v873_v47 = vadd.f32 %v2872_v58, %v811_v51  ;;  %v874_v39 = vadd.f32 %v2875_v21, %v812_v41 }
 0x170   :  { %v929_v51 = vmax.f32 %v873_v47, 0.0  ;;  %v930_v41 = vmax.f32 %v874_v39, 0.0 }
 0x173   :  { %v629_v29 = vpop.f32.mrf.mxu0  ;;  %v730_v49 = vpop.f32.mrf.mxu1 }
 0x174   :  { %v813_v61 = vadd.f32 %v629_v29, %v2460_v54  ;;  %v814_v31 = vadd.f32 %v730_v49, %v2494_v4 }
 0x175   :  { %1994 = vmatmul.msk.f32.gmra.mxu0 %vm105_vm0, %v2458_v53 }
 0x176   :  { %v875_v30 = vadd.f32 %v2872_v58, %v813_v61  ;;  %v876_v12 = vadd.f32 %v2875_v21, %v814_v31  ;;  %2022 = vmatmul.msk.f32.gmra.mxu1 %vm105_vm0, %v2458_v53  ;;  %v2092_v61 = vld [vmem:[%s3533_s3 + $0x2d8] sm:$0xff]  ;;  %v2911_v53 = vpop.f32.mrf.mxu2 }
 0x177   :  { %1422 = vmatpush.msra.mxu1 %v2092_v61 }
 0x178   :  { %v931_v28 = vmax.f32 %v875_v30, 0.0  ;;  %v932_v54 = vmax.f32 %v876_v12, 0.0 }
 0x17a   :  { %v985_v29 = vmax.f32 %v929_v51, %v931_v28  ;;  %v986_v4 = vmax.f32 %v930_v41, %v932_v54  ;;  %v2913_v28 = vpop.f32.mrf.mxu3 }
 0x17b   :  { %v632_v49 = vpop.f32.mrf.mxu0  ;;  %v733_v57 = vpop.f32.mrf.mxu1 }
 0x17c   :  { %v2897_v27 = vmax.f32 %v985_v29, %v986_v4  ;;  %v815_v47 = vadd.f32 %v632_v49, %v2475_v60  ;;  %v816_v39 = vadd.f32 %v733_v57, %v2513_v9 }
 0x17d   :  { %1995 = vmatmul.msk.f32.gmra.mxu0 %vm105_vm0, %v2473_v59 }
 0x17e   :  { %2023 = vmatmul.msk.f32.gmra.mxu1 %vm105_vm0, %v2473_v59  ;;  %1108 = vmatmul.f32.vlgmr.msrb.gmra.mxu2 %v2897_v27  ;;  %v877_v12 = vadd.f32 %v2872_v58, %v815_v47  ;;  %v878_v51 = vadd.f32 %v2875_v21, %v816_v39  ;;  %v2927_v4 = vpop.f32.mrf.mxu2 }
 0x17f   :  { %1167 = vmatmul.f32.vlgmr.msrb.gmra.mxu3 %v2897_v27 }
 0x180   :  { %v933_v60 = vmax.f32 %v877_v12, 0.0  ;;  %v934_v9 = vmax.f32 %v878_v51, 0.0  ;;  %v526_v12 = vadd.f32 %v2814_v34, %v2498_v6 }
 0x182   :  { %v2929_v49 = vpop.f32.mrf.mxu3 }
 0x183   :  { %v635_v31 = vpop.f32.mrf.mxu0  ;;  %v736_v30 = vpop.f32.mrf.mxu1 }
 0x184   :  { %v817_v59 = vadd.f32 %v635_v31, %v2492_v3  ;;  %v818_v41 = vadd.f32 %v736_v30, %v2532_v14  ;;  %v2089_v31 = vld [vmem:[%s3533_s3 + $0x2c0] sm:$0xff]  ;;  %v425_v30 = vadd.f32 %v2812_v45, %v2496_v5 }
 0x185   :  { %1996 = vmatmul.msk.f32.gmra.mxu0 %vm105_vm0, %v2490_v2 }
 0x186   :  { %v879_v48 = vadd.f32 %v2872_v58, %v817_v59  ;;  %v880_v54 = vadd.f32 %v2875_v21, %v818_v41  ;;  %2024 = vmatmul.msk.f32.gmra.mxu1 %vm105_vm0, %v2490_v2  ;;  %v2090_v2 = vld [vmem:[%s3533_s3 + $0x2c8] sm:$0xff]  ;;  %1364 = vmatpush.msra.mxu0 %v2089_v31  ;;  %v428_v41 = vadd.f32 %v2848_v35, %v2515_v10 }
 0x187   :  { %1423 = vmatpush.msra.mxu1 %v2090_v2 }
 0x188   :  { %v935_v57 = vmax.f32 %v879_v48, 0.0  ;;  %v936_v29 = vmax.f32 %v880_v54, 0.0  ;;  %v529_v48 = vadd.f32 %v2850_v37, %v2517_v11  ;;  %v2953_v54 = vpop.f32.mrf.mxu2  ;;  %v2087_v11 = vld [vmem:[%s3533_s3 + $0x2b0] sm:$0xff]  ;;  %v2088_v37 = vld [vmem:[%s3533_s3 + $0x2b8] sm:$0xff] }
 0x189   :  { %1365 = vmatpush.msra.mxu0 %v2087_v11  ;;  %1424 = vmatpush.msra.mxu1 %v2088_v37  ;;  %v2075_v37 = vld [vmem:[%s3533_s3 + $0x250] sm:$0xff] }
 0x18a   :  { %v987_v3 = vmax.f32 %v933_v60, %v935_v57  ;;  %v988_v14 = vmax.f32 %v934_v9, %v936_v29  ;;  %v2955_v6 = vpop.f32.mrf.mxu3 }
 0x18b   :  { %v638_v61 = vpop.f32.mrf.mxu0  ;;  %v739_v47 = vpop.f32.mrf.mxu1 }
 0x18c   :  { %v2931_v39 = vmax.f32 %v987_v3, %v988_v14  ;;  %v819_v51 = vadd.f32 %v638_v61, %v425_v30  ;;  %v820_v59 = vadd.f32 %v739_v47, %v526_v12  ;;  %v2085_v61 = vld [vmem:[%s3533_s3 + $0x2a0] sm:$0xff]  ;;  %v2083_v12 = vld [vmem:[%s3533_s3 + $0x290] sm:$0xff] }
 0x18d   :  { %1997 = vmatmul.msk.f32.gmra.mxu0 %vm105_vm0, %v2511_v8 }
 0x18e   :  { %2025 = vmatmul.msk.f32.gmra.mxu1 %vm105_vm0, %v2511_v8  ;;  %1111 = vmatmul.f32.gmra.mxu2 %v2931_v39  ;;  %v881_v8 = vadd.f32 %v2872_v58, %v819_v51  ;;  %v882_v34 = vadd.f32 %v2875_v21, %v820_v59  ;;  %v2084_v51 = vld [vmem:[%s3533_s3 + $0x298] sm:$0xff] }
 0x18f   :  { %1170 = vmatmul.f32.gmra.mxu3 %v2931_v39  ;;  %1366 = vmatpush.msra.mxu0 %v2085_v61  ;;  %v2074_v61 = vld [vmem:[%s3533_s3 + $0x248] sm:$0xff] }
 0x190   :  { %v937_v57 = vmax.f32 %v881_v8, 0.0  ;;  %v938_v29 = vmax.f32 %v882_v34, 0.0  ;;  %v2997_v8 = vpop.f32.mrf.mxu2 }
 0x191   :  { %1367 = vmatpush.msra.mxu0 %v2083_v12 }
 0x192   :  { %v2999_v34 = vpop.f32.mrf.mxu3 }
 0x193   :  { %v641_v5 = vpop.f32.mrf.mxu0  ;;  %v742_v45 = vpop.f32.mrf.mxu1 }
 0x194   :  { %v821_v60 = vadd.f32 %v641_v5, %v428_v41  ;;  %v822_v9 = vadd.f32 %v742_v45, %v529_v48  ;;  %v2081_v41 = vld [vmem:[%s3533_s3 + $0x280] sm:$0xff]  ;;  %v2082_v48 = vld [vmem:[%s3533_s3 + $0x288] sm:$0xff]  ;;  %v431_v5 = vadd.f32 %v2860_v38, %v2534_v15  ;;  %v532_v45 = vadd.f32 %v2862_v46, %v2536_v16  ;;  %v2080_v15 = vld [vmem:[%s3533_s3 + $0x278] sm:$0xff] }
 0x195   :  { %1998 = vmatmul.msk.f32.gmra.mxu0 %vm105_vm0, %v2530_v13  ;;  %v2078_v46 = vld [vmem:[%s3533_s3 + $0x268] sm:$0xff] }
 0x196   :  { %v883_v10 = vadd.f32 %v2872_v58, %v821_v60  ;;  %v884_v35 = vadd.f32 %v2875_v21, %v822_v9  ;;  %2026 = vmatmul.msk.f32.gmra.mxu1 %vm105_vm0, %v2530_v13  ;;  %v2086_v13 = vld [vmem:[%s3533_s3 + $0x2a8] sm:$0xff]  ;;  %1368 = vmatpush.msra.mxu0 %v2081_v41  ;;  %v2079_v60 = vld [vmem:[%s3533_s3 + $0x270] sm:$0xff]  ;;  %v434_v9 = vadd.f32 %v2889_v36, %v2551_v19  ;;  %v2076_v19 = vld [vmem:[%s3533_s3 + $0x258] sm:$0xff] }
 0x197   :  { %1425 = vmatpush.msra.mxu1 %v2086_v13  ;;  %v2071_v13 = vld [vmem:[%s3533_s3 + $0x230] sm:$0xff]  ;;  %v2069_v41 = vld [vmem:[%s3533_s3 + $0x220] sm:$0xff] }
 0x198   :  { %v939_v3 = vmax.f32 %v883_v10, 0.0  ;;  %v940_v14 = vmax.f32 %v884_v35, 0.0  ;;  %1369 = vmatpush.msra.mxu0 %v2079_v60  ;;  %v535_v10 = vadd.f32 %v2891_v1, %v2553_v20  ;;  %v2073_v20 = vld [vmem:[%s3533_s3 + $0x240] sm:$0xff] }
 0x199   :  { %1426 = vmatpush.msra.mxu1 %v2084_v51 }
 0x19a   :  { %v989_v47 = vmax.f32 %v937_v57, %v939_v3  ;;  %v990_v31 = vmax.f32 %v938_v29, %v940_v14 }
 0x19b   :  { %v644_v2 = vpop.f32.mrf.mxu0  ;;  %v745_v30 = vpop.f32.mrf.mxu1  ;;  %1427 = vmatpush.msra.mxu1 %v2082_v48 }
 0x19c   :  { %v2983_v59 = vmax.f32 %v989_v47, %v990_v31  ;;  %v823_v16 = vadd.f32 %v644_v2, %v431_v5  ;;  %v824_v38 = vadd.f32 %v745_v30, %v532_v45  ;;  %v3044_v47 = vpop.f32.mrf.mxu2  ;;  %v3046_v31 = vpop.f32.mrf.mxu3  ;;  %v2070_v45 = vld [vmem:[%s3533_s3 + $0x228] sm:$0xff] }
 0x19d   :  { %1999 = vmatmul.msk.f32.gmra.mxu0 %vm105_vm0, %v2549_v18  ;;  %1428 = vmatpush.msra.mxu1 %v2080_v15 }
 0x19e   :  { %2027 = vmatmul.msk.f32.gmra.mxu1 %vm105_vm0, %v2549_v18  ;;  %1114 = vmatmul.f32.gmra.mxu2 %v2983_v59  ;;  %v2077_v18 = vld [vmem:[%s3533_s3 + $0x260] sm:$0xff]  ;;  %v885_v57 = vadd.f32 %v2872_v58, %v823_v16  ;;  %v886_v29 = vadd.f32 %v2875_v21, %v824_v38  ;;  %v2067_v38 = vld [vmem:[%s3533_s3 + $0x210] sm:$0xff] }
 0x19f   :  { %1173 = vmatmul.f32.gmra.mxu3 %v2983_v59  ;;  %1370 = vmatpush.msra.mxu0 %v2077_v18  ;;  %v2068_v18 = vld [vmem:[%s3533_s3 + $0x218] sm:$0xff] }
 0x1a0   :  { %1429 = vmatpush.msra.mxu1 %v2078_v46  ;;  %v941_v2 = vmax.f32 %v885_v57, 0.0  ;;  %v942_v30 = vmax.f32 %v886_v29, 0.0  ;;  %v437_v46 = vadd.f32 %v2911_v53, %v2568_v23 }
 0x1a1   :  { %1371 = vmatpush.msra.mxu0 %v2075_v37 }
 0x1a2   :  { %1430 = vmatpush.msra.mxu1 %v2076_v19 }
 0x1a3   :  { %v647_v35 = vpop.f32.mrf.mxu0  ;;  %v748_v11 = vpop.f32.mrf.mxu1  ;;  %1372 = vmatpush.msra.mxu0 %v2073_v20 }
 0x1a4   :  { %v825_v3 = vadd.f32 %v647_v35, %v434_v9  ;;  %v826_v14 = vadd.f32 %v748_v11, %v535_v10  ;;  %1431 = vmatpush.msra.mxu1 %v2074_v61  ;;  %v538_v9 = vadd.f32 %v2913_v28, %v2570_v24  ;;  %v2065_v10 = vld [vmem:[%s3533_s3 + $0x200] sm:$0xff]  ;;  %v2066_v35 = vld [vmem:[%s3533_s3 + $0x208] sm:$0xff]  ;;  %v440_v24 = vadd.f32 %v2927_v4, %v2585_v33  ;;  %v3085_v28 = vpop.f32.mrf.mxu2  ;;  %v3087_v11 = vpop.f32.mrf.mxu3 }
 0x1a5   :  { %2000 = vmatmul.msk.f32.gmra.mxu0 %vm105_vm0, %v2566_v22 }
 0x1a6   :  { %v887_v1 = vadd.f32 %v2872_v58, %v825_v3  ;;  %v888_v36 = vadd.f32 %v2875_v21, %v826_v14  ;;  %2028 = vmatmul.msk.f32.gmra.mxu1 %vm105_vm0, %v2566_v22  ;;  %v2072_v22 = vld [vmem:[%s3533_s3 + $0x238] sm:$0xff]  ;;  %1373 = vmatpush.msra.mxu0 %v2071_v13 }
 0x1a7   :  { %1432 = vmatpush.msra.mxu1 %v2072_v22  ;;  %v2113_v22 = vld [vmem:[%s3530_s0 + $0xe0] sm:$0xff] }
 0x1a8   :  { %v943_v12 = vmax.f32 %v887_v1, 0.0  ;;  %v944_v51 = vmax.f32 %v888_v36, 0.0  ;;  %1374 = vmatpush.msra.mxu0 %v2069_v41  ;;  %v544_v41 = vadd.f32 %v2955_v6, %v2604_v44 }
 0x1a9   :  { %1433 = vmatpush.msra.mxu1 %v2070_v45  ;;  %v446_v45 = vadd.f32 %v2997_v8, %v2620_v50 }
 0x1aa   :  { %v991_v48 = vmax.f32 %v941_v2, %v943_v12  ;;  %v992_v5 = vmax.f32 %v942_v30, %v944_v51  ;;  %1375 = vmatpush.msra.mxu0 %v2067_v38 }
 0x1ab   :  { %v650_v60 = vpop.f32.mrf.mxu0  ;;  %v751_v15 = vpop.f32.mrf.mxu1  ;;  %1434 = vmatpush.msra.mxu1 %v2068_v18 }
 0x1ac   :  { %v3057_v16 = vmax.f32 %v991_v48, %v992_v5  ;;  %v827_v23 = vadd.f32 %v650_v60, %v437_v46  ;;  %v828_v53 = vadd.f32 %v751_v15, %v538_v9  ;;  %1376 = vmatpush.msra.mxu0 %v2065_v10  ;;  %v3097_v30 = vpop.f32.mrf.mxu2  ;;  %v3099_v12 = vpop.f32.mrf.mxu3  ;;  %v547_v60 = vadd.f32 %v2999_v34, %v2622_v52 }
 0x1ad   :  { %2001 = vmatmul.msk.f32.gmra.mxu0 %vm105_vm0, %v2583_v32  ;;  %1435 = vmatpush.msra.mxu1 %v2066_v35 }
 0x1ae   :  { %2029 = vmatmul.msk.f32.gmra.mxu1 %vm105_vm0, %v2583_v32  ;;  %1117 = vmatmul.f32.gmra.mxu2 %v3057_v16  ;;  %v541_v32 = vadd.f32 %v2929_v49, %v2587_v40  ;;  %v889_v29 = vadd.f32 %v2872_v58, %v827_v23  ;;  %v890_v3 = vadd.f32 %v2875_v21, %v828_v53 }
 0x1af   :  { %1176 = vmatmul.f32.gmra.mxu3 %v3057_v16 }
 0x1b0   :  { %v945_v4 = vmax.f32 %v889_v29, 0.0  ;;  %v946_v49 = vmax.f32 %v890_v3, 0.0  ;;  %v1058_v29 = vld [vmem:[%s3533_s3 + $0xf8] sm:$0xff]  ;;  %v449_v3 = vadd.f32 %v3044_v47, %v2632_v55  ;;  %v1055_v55 = vld [vmem:[%s3533_s3 + $0xe0] sm:$0xff]  ;;  %v452_v47 = vadd.f32 %v3085_v28, %v2648_v17 }
 0x1b1   :  { %1269 = vmatpush.msra.mxu3 %v1058_v29 }
 0x1b3   :  { %v653_v37 = vpop.f32.mrf.mxu0  ;;  %v754_v57 = vpop.f32.mrf.mxu1 }
 0x1b4   :  { %v829_v14 = vadd.f32 %v653_v37, %v440_v24  ;;  %v830_v19 = vadd.f32 %v754_v57, %v541_v32  ;;  %v3124_v46 = vpop.f32.mrf.mxu2  ;;  %v3126_v50 = vpop.f32.mrf.mxu3  ;;  %v1057_v57 = vld [vmem:[%s3533_s3 + $0xf0] sm:$0xff] }
 0x1b5   :  { %2002 = vmatmul.msk.f32.gmra.mxu0 %vm105_vm0, %v2600_v42  ;;  %1210 = vmatpush.msra.mxu2 %v1057_v57 }
 0x1b6   :  { %v891_v33 = vadd.f32 %v2872_v58, %v829_v14  ;;  %v892_v40 = vadd.f32 %v2875_v21, %v830_v19  ;;  %2030 = vmatmul.msk.f32.gmra.mxu1 %vm105_vm0, %v2600_v42  ;;  %v443_v42 = vadd.f32 %v2953_v54, %v2602_v43  ;;  %v87_v43 = vld [vmem:[%s3530_s0 + $0xe8] sm:$0xff]  ;;  %v550_v14 = vadd.f32 %v3046_v31, %v2634_v56 }
 0x1b7   :  { %v1056_v56 = vld [vmem:[%s3533_s3 + $0xe8] sm:$0xff]  ;;  %1211 = vmatpush.msra.mxu2 %v1055_v55  ;;  %v553_v31 = vadd.f32 %v3087_v11, %v2650_v62 }
 0x1b8   :  { %v947_v20 = vmax.f32 %v891_v33, 0.0  ;;  %v948_v1 = vmax.f32 %v892_v40, 0.0  ;;  %1270 = vmatpush.msra.mxu3 %v1056_v56  ;;  %v1047_v56 = vld [vmem:[%s3533_s3 + $0xa0] sm:$0xff] }
 0x1ba   :  { %v993_v36 = vmax.f32 %v945_v4, %v947_v20  ;;  %v994_v61 = vmax.f32 %v946_v49, %v948_v1 }
 0x1bb   :  { %v656_v13 = vpop.f32.mrf.mxu0  ;;  %v757_v2 = vpop.f32.mrf.mxu1 }
 0x1bc   :  { %v3101_v51 = vmax.f32 %v993_v36, %v994_v61  ;;  %v831_v48 = vadd.f32 %v656_v13, %v443_v42  ;;  %v832_v5 = vadd.f32 %v757_v2, %v544_v41  ;;  %v3147_v19 = vpop.f32.mrf.mxu2  ;;  %v3149_v33 = vpop.f32.mrf.mxu3 }
 0x1bd   :  { %2003 = vmatmul.msk.f32.gmra.mxu0 %vm105_vm0, %v2113_v22 }
 0x1be   :  { %2031 = vmatmul.msk.f32.gmra.mxu1 %vm105_vm0, %v2113_v22  ;;  %1120 = vmatmul.f32.gmra.mxu2 %v3101_v51  ;;  %v893_v6 = vadd.f32 %v2872_v58, %v831_v48  ;;  %v894_v15 = vadd.f32 %v2875_v21, %v832_v5 }
 0x1bf   :  { %1179 = vmatmul.f32.gmra.mxu3 %v3101_v51 }
 0x1c0   :  { %v949_v34 = vmax.f32 %v893_v6, 0.0  ;;  %v950_v9 = vmax.f32 %v894_v15, 0.0  ;;  %v455_v6 = vadd.f32 %v3097_v30, %v2658_v63  ;;  %v556_v15 = vadd.f32 %v3099_v12, %v2660_v0  ;;  %v1052_v63 = vld [vmem:[%s3533_s3 + $0xc8] sm:$0xff]  ;;  %v1049_v12 = vld [vmem:[%s3533_s3 + $0xb0] sm:$0xff] }
 0x1c1   :  { %v458_v0 = vadd.f32 %v3124_v46, %v2672_v25  ;;  %v559_v30 = vadd.f32 %v3126_v50, %v2674_v7 }
 0x1c3   :  { %v659_v54 = vpop.f32.mrf.mxu0  ;;  %v760_v44 = vpop.f32.mrf.mxu1 }
 0x1c4   :  { %v833_v38 = vadd.f32 %v659_v54, %v446_v45  ;;  %v834_v18 = vadd.f32 %v760_v44, %v547_v60  ;;  %v3167_v11 = vpop.f32.mrf.mxu2  ;;  %v3169_v41 = vpop.f32.mrf.mxu3  ;;  %v1053_v54 = vld [vmem:[%s3533_s3 + $0xd0] sm:$0xff]  ;;  %v1054_v44 = vld [vmem:[%s3533_s3 + $0xd8] sm:$0xff] }
 0x1c5   :  { %2004 = vmatmul.msk.f32.gmra.mxu0 %vm105_vm0, %v87_v43  ;;  %1212 = vmatpush.msra.mxu2 %v1053_v54 }
 0x1c6   :  { %v895_v52 = vadd.f32 %v2872_v58, %v833_v38  ;;  %v896_v8 = vadd.f32 %v2875_v21, %v834_v18  ;;  %2032 = vmatmul.msk.f32.gmra.mxu1 %vm105_vm0, %v87_v43  ;;  %1271 = vmatpush.msra.mxu3 %v1054_v44 }
 0x1c8   :  { %v951_v10 = vmax.f32 %v895_v52, 0.0  ;;  %v952_v35 = vmax.f32 %v896_v8, 0.0  ;;  %v1051_v52 = vld [vmem:[%s3533_s3 + $0xc0] sm:$0xff]  ;;  %1272 = vmatpush.msra.mxu3 %v1052_v63  ;;  %v1050_v8 = vld [vmem:[%s3533_s3 + $0xb8] sm:$0xff] }
 0x1c9   :  { %1213 = vmatpush.msra.mxu2 %v1051_v52 }
 0x1ca   :  { %v995_v23 = vmax.f32 %v949_v34, %v951_v10  ;;  %v996_v53 = vmax.f32 %v950_v9, %v952_v35  ;;  %1273 = vmatpush.msra.mxu3 %v1050_v8  ;;  %v1044_v8 = vld [vmem:[%s3533_s3 + $0x88] sm:$0xff] }
 0x1cb   :  { %v662_v24 = vpop.f32.mrf.mxu0  ;;  %v763_v32 = vpop.f32.mrf.mxu1  ;;  %1214 = vmatpush.msra.mxu2 %v1049_v12  ;;  %v1043_v12 = vld [vmem:[%s3533_s3 + $0x80] sm:$0xff] }
 0x1cc   :  { %v3131_v37 = vmax.f32 %v995_v23, %v996_v53  ;;  %v835_v40 = vadd.f32 %v662_v24, %v449_v3  ;;  %v836_v4 = vadd.f32 %v763_v32, %v550_v14  ;;  %v3203_v10 = vpop.f32.mrf.mxu2  ;;  %v3205_v35 = vpop.f32.mrf.mxu3 }
 0x1cd   :  { %1377 = vmatmul.f32.vlgmr.msra.gmra.mxu0 %v2931_v39  ;;  %1215 = vmatpush.msra.mxu2 %v1047_v56 }
 0x1ce   :  { %1123 = vmatmul.f32.gmra.mxu2 %v3131_v37  ;;  %1182 = vmatmul.f32.gmra.mxu3 %v3131_v37  ;;  %v897_v1 = vadd.f32 %v2872_v58, %v835_v40  ;;  %v898_v36 = vadd.f32 %v2875_v21, %v836_v4 }
 0x1cf   :  { %1436 = vmatmul.f32.vlgmr.msra.gmra.mxu1 %v2931_v39 }
 0x1d0   :  { %v953_v17 = vmax.f32 %v897_v1, 0.0  ;;  %v954_v28 = vmax.f32 %v898_v36, 0.0 }
 0x1d3   :  { %v665_v49 = vpop.f32.mrf.mxu0  ;;  %v766_v20 = vpop.f32.mrf.mxu1 }
 0x1d4   :  { %v837_v61 = vadd.f32 %v665_v49, %v452_v47  ;;  %v838_v13 = vadd.f32 %v766_v20, %v553_v31  ;;  %v1048_v47 = vld [vmem:[%s3533_s3 + $0xa8] sm:$0xff]  ;;  %v461_v31 = vadd.f32 %v3147_v19, %v2686_v26  ;;  %v3561_v49 = vld [vmem:[#allocation10_spill] sm:$0xff]  ;;  %v469_v1 = vpop.f32.mrf.mxu2  ;;  %v570_v36 = vpop.f32.mrf.mxu3  ;;  %v1046_v26 = vld [vmem:[%s3533_s3 + $0x98] sm:$0xff] }
 0x1d5   :  { %1380 = vmatmul.f32.gmra.mxu0 %v2983_v59  ;;  %v562_v20 = vadd.f32 %v3149_v33, %v3561_v49  ;;  %1274 = vmatpush.msra.mxu3 %v1048_v47  ;;  %v3562_v19 = vld [vmem:[#allocation11_spill] sm:$0xff] }
 0x1d6   :  { %v899_v2 = vadd.f32 %v2872_v58, %v837_v61  ;;  %v900_v22 = vadd.f32 %v2875_v21, %v838_v13  ;;  %v464_v33 = vadd.f32 %v3167_v11, %v3562_v19 }
 0x1d7   :  { %1439 = vmatmul.f32.gmra.mxu1 %v2983_v59  ;;  %1275 = vmatpush.msra.mxu3 %v1046_v26 }
 0x1d8   :  { %v955_v42 = vmax.f32 %v899_v2, 0.0  ;;  %v956_v62 = vmax.f32 %v900_v22, 0.0  ;;  %v1045_v2 = vld [vmem:[%s3533_s3 + $0x90] sm:$0xff]  ;;  %v3563_v22 = vld [vmem:[#allocation12_spill] sm:$0xff] }
 0x1d9   :  { %1216 = vmatpush.msra.mxu2 %v1045_v2  ;;  %1276 = vmatpush.msra.mxu3 %v1044_v8 }
 0x1da   :  { %v997_v48 = vmax.f32 %v953_v17, %v955_v42  ;;  %v998_v5 = vmax.f32 %v954_v28, %v956_v62  ;;  %v565_v17 = vadd.f32 %v3169_v41, %v3563_v22 }
 0x1db   :  { %v668_v45 = vpop.f32.mrf.mxu0  ;;  %v769_v60 = vpop.f32.mrf.mxu1  ;;  %1217 = vmatpush.msra.mxu2 %v1043_v12 }
 0x1dc   :  { %v3171_v43 = vmax.f32 %v997_v48, %v998_v5  ;;  %v839_v38 = vadd.f32 %v668_v45, %v455_v6  ;;  %v840_v18 = vadd.f32 %v769_v60, %v556_v15  ;;  %v472_v11 = vpop.f32.mrf.mxu2  ;;  %v573_v44 = vpop.f32.mrf.mxu3 }
 0x1dd   :  { %1383 = vmatmul.f32.gmra.mxu0 %v3057_v16 }
 0x1de   :  { %1126 = vmatmul.f32.gmra.mxu2 %v3171_v43  ;;  %1185 = vmatmul.f32.gmra.mxu3 %v3171_v43  ;;  %v901_v25 = vadd.f32 %v2872_v58, %v839_v38  ;;  %v902_v7 = vadd.f32 %v2875_v21, %v840_v18 }
 0x1df   :  { %1442 = vmatmul.f32.gmra.mxu1 %v3057_v16 }
 0x1e0   :  { %v957_v24 = vmax.f32 %v901_v25, 0.0  ;;  %v958_v32 = vmax.f32 %v902_v7, 0.0  ;;  %v3565_v25 = vld [vmem:[#allocation14_spill] sm:$0xff] }
 0x1e1   :  { %v568_v7 = vadd.f32 %v3205_v35, %v3565_v25  ;;  %v3566_v35 = vld [vmem:[#allocation15_spill] sm:$0xff] }
 0x1e3   :  { %v671_v34 = vpop.f32.mrf.mxu0  ;;  %v772_v9 = vpop.f32.mrf.mxu1 }
 0x1e4   :  { %v841_v46 = vadd.f32 %v671_v34, %v458_v0  ;;  %v842_v50 = vadd.f32 %v772_v9, %v559_v30  ;;  %v3564_v34 = vld [vmem:[#allocation13_spill] sm:$0xff] }
 0x1e5   :  { %1386 = vmatmul.f32.gmra.mxu0 %v3101_v51  ;;  %v467_v9 = vadd.f32 %v3203_v10, %v3564_v34  ;;  %v1042_v10 = vld [vmem:[%s3533_s3 + $0x78] sm:$0xff] }
 0x1e6   :  { %v903_v23 = vadd.f32 %v2872_v58, %v841_v46  ;;  %v904_v53 = vadd.f32 %v2875_v21, %v842_v50  ;;  %1277 = vmatpush.msra.mxu3 %v1042_v10 }
 0x1e7   :  { %1445 = vmatmul.f32.gmra.mxu1 %v3101_v51 }
 0x1e8   :  { %v959_v57 = vmax.f32 %v903_v23, 0.0  ;;  %v960_v29 = vmax.f32 %v904_v53, 0.0  ;;  %v1041_v23 = vld [vmem:[%s3533_s3 + $0x70] sm:$0xff]  ;;  %v470_v53 = vadd.f32 %v469_v1, %v3566_v35 }
 0x1e9   :  { %1218 = vmatpush.msra.mxu2 %v1041_v23 }
 0x1ea   :  { %v999_v3 = vmax.f32 %v957_v24, %v959_v57  ;;  %v1000_v14 = vmax.f32 %v958_v32, %v960_v29  ;;  %v475_v24 = vpop.f32.mrf.mxu2  ;;  %v3567_v32 = vld [vmem:[#allocation16_spill] sm:$0xff]  ;;  %v576_v29 = vpop.f32.mrf.mxu3 }
 0x1eb   :  { %v674_v40 = vpop.f32.mrf.mxu0  ;;  %v775_v4 = vpop.f32.mrf.mxu1  ;;  %v571_v57 = vadd.f32 %v570_v36, %v3567_v32 }
 0x1ec   :  { %v3213_v55 = vmax.f32 %v999_v3, %v1000_v14  ;;  %v843_v61 = vadd.f32 %v674_v40, %v461_v31  ;;  %v844_v13 = vadd.f32 %v775_v4, %v562_v20 }
 0x1ed   :  { %1389 = vmatmul.f32.gmra.mxu0 %v3131_v37 }
 0x1ee   :  { %1129 = vmatmul.f32.gmra.mxu2 %v3213_v55  ;;  %1188 = vmatmul.f32.gmra.mxu3 %v3213_v55  ;;  %v905_v62 = vadd.f32 %v2872_v58, %v843_v61  ;;  %v906_v48 = vadd.f32 %v2875_v21, %v844_v13 }
 0x1ef   :  { %1448 = vmatmul.f32.gmra.mxu1 %v3131_v37 }
 0x1f0   :  { %v961_v6 = vmax.f32 %v905_v62, 0.0  ;;  %v962_v41 = vmax.f32 %v906_v48, 0.0  ;;  %v3568_v62 = vld [vmem:[#allocation17_spill] sm:$0xff] }
 0x1f1   :  { %v473_v48 = vadd.f32 %v472_v11, %v3568_v62  ;;  %v1038_v11 = vld [vmem:[%s3533_s3 + $0x58] sm:$0xff] }
 0x1f2   :  { %v579_v22 = vpop.f32.mrf.mxu3 }
 0x1f3   :  { %v677_v28 = vpop.f32.mrf.mxu0  ;;  %v778_v42 = vpop.f32.mrf.mxu1 }
 0x1f4   :  { %v845_v5 = vadd.f32 %v677_v28, %v464_v33  ;;  %v846_v45 = vadd.f32 %v778_v42, %v565_v17  ;;  %v478_v33 = vpop.f32.mrf.mxu2  ;;  %v1039_v28 = vld [vmem:[%s3533_s3 + $0x60] sm:$0xff]  ;;  %v1040_v42 = vld [vmem:[%s3533_s3 + $0x68] sm:$0xff] }
 0x1f5   :  { %1392 = vmatmul.f32.gmra.mxu0 %v3171_v43  ;;  %1219 = vmatpush.msra.mxu2 %v1039_v28 }
 0x1f6   :  { %v907_v60 = vadd.f32 %v2872_v58, %v845_v5  ;;  %v908_v54 = vadd.f32 %v2875_v21, %v846_v45  ;;  %1278 = vmatpush.msra.mxu3 %v1040_v42  ;;  %v3569_v5 = vld [vmem:[#allocation18_spill] sm:$0xff] }
 0x1f7   :  { %1451 = vmatmul.f32.gmra.mxu1 %v3171_v43  ;;  %v574_v45 = vadd.f32 %v573_v44, %v3569_v5  ;;  %v3570_v44 = vld [vmem:[#allocation19_spill] sm:$0xff] }
 0x1f8   :  { %v963_v15 = vmax.f32 %v907_v60, 0.0  ;;  %v964_v38 = vmax.f32 %v908_v54, 0.0  ;;  %1279 = vmatpush.msra.mxu3 %v1038_v11 }
 0x1fa   :  { %v1001_v18 = vmax.f32 %v961_v6, %v963_v15  ;;  %v1002_v52 = vmax.f32 %v962_v41, %v964_v38  ;;  %v1037_v6 = vld [vmem:[%s3533_s3 + $0x50] sm:$0xff]  ;;  %v476_v41 = vadd.f32 %v475_v24, %v3570_v44  ;;  %v3571_v15 = vld [vmem:[#allocation20_spill] sm:$0xff] }
 0x1fb   :  { %v680_v63 = vpop.f32.mrf.mxu0  ;;  %v781_v0 = vpop.f32.mrf.mxu1  ;;  %1220 = vmatpush.msra.mxu2 %v1037_v6  ;;  %v577_v38 = vadd.f32 %v576_v29, %v3571_v15  ;;  %v1035_v29 = vld [vmem:[%s3533_s3 + $0x40] sm:$0xff] }
 0x1fc   :  { %v3245_v30 = vmax.f32 %v1001_v18, %v1002_v52  ;;  %v847_v46 = vadd.f32 %v680_v63, %v467_v9  ;;  %v848_v50 = vadd.f32 %v781_v0, %v568_v7  ;;  %v481_v34 = vpop.f32.mrf.mxu2  ;;  %v582_v9 = vpop.f32.mrf.mxu3 }
 0x1fd   :  { %1395 = vmatmul.f32.gmra.mxu0 %v3213_v55  ;;  %1221 = vmatpush.msra.mxu2 %v1035_v29 }
 0x1fe   :  { %1132 = vmatmul.f32.gmra.mxu2 %v3245_v30  ;;  %1191 = vmatmul.f32.gmra.mxu3 %v3245_v30  ;;  %v909_v40 = vadd.f32 %v2872_v58, %v847_v46  ;;  %v910_v4 = vadd.f32 %v2875_v21, %v848_v50 }
 0x1ff   :  { %1454 = vmatmul.f32.gmra.mxu1 %v3213_v55 }
 0x200   :  { %v965_v20 = vmax.f32 %v909_v40, 0.0  ;;  %v966_v1 = vmax.f32 %v910_v4, 0.0  ;;  %v1034_v40 = vld [vmem:[%s3533_s3 + $0x38] sm:$0xff]  ;;  %v3572_v4 = vld [vmem:[#allocation21_spill] sm:$0xff] }
 0x203   :  { %v683_v3 = vpop.f32.mrf.mxu0  ;;  %v784_v14 = vpop.f32.mrf.mxu1 }
 0x204   :  { %v849_v56 = vadd.f32 %v683_v3, %v470_v53  ;;  %v850_v47 = vadd.f32 %v784_v14, %v571_v57  ;;  %v1036_v3 = vld [vmem:[%s3533_s3 + $0x48] sm:$0xff]  ;;  %v1033_v14 = vld [vmem:[%s3533_s3 + $0x30] sm:$0xff] }
 0x205   :  { %1398 = vmatmul.f32.gmra.mxu0 %v3245_v30  ;;  %1280 = vmatpush.msra.mxu3 %v1036_v3 }
 0x206   :  { %v911_v31 = vadd.f32 %v2872_v58, %v849_v56  ;;  %v912_v49 = vadd.f32 %v2875_v21, %v850_v47  ;;  %v479_v56 = vadd.f32 %v478_v33, %v3572_v4  ;;  %v3573_v47 = vld [vmem:[#allocation22_spill] sm:$0xff]  ;;  %1222 = vmatpush.msra.mxu2 %v1033_v14  ;;  %v1032_v33 = vld [vmem:[%s3533_s3 + $0x28] sm:$0xff] }
 0x207   :  { %1457 = vmatmul.f32.gmra.mxu1 %v3245_v30  ;;  %1281 = vmatpush.msra.mxu3 %v1034_v40 }
 0x208   :  { %v967_v36 = vmax.f32 %v911_v31, 0.0  ;;  %v968_v61 = vmax.f32 %v912_v49, 0.0  ;;  %v580_v31 = vadd.f32 %v579_v22, %v3573_v47  ;;  %v484_v49 = vpop.f32.mrf.mxu2 }
 0x209   :  { %1282 = vmatpush.msra.mxu3 %v1032_v33 }
 0x20a   :  { %v1003_v13 = vmax.f32 %v965_v20, %v967_v36  ;;  %v1004_v2 = vmax.f32 %v966_v1, %v968_v61  ;;  %v585_v20 = vpop.f32.mrf.mxu3  ;;  %v3574_v61 = vld [vmem:[#allocation23_spill] sm:$0xff] }
 0x20b   :  { %v686_v26 = vpop.f32.mrf.mxu0  ;;  %v787_v19 = vpop.f32.mrf.mxu1 }
 0x20c   :  { %v3275_v17 = vmax.f32 %v1003_v13, %v1004_v2  ;;  %v851_v60 = vadd.f32 %v686_v26, %v473_v48  ;;  %v852_v54 = vadd.f32 %v787_v19, %v574_v45  ;;  %v482_v13 = vadd.f32 %v481_v34, %v3574_v61  ;;  %v3575_v2 = vld [vmem:[#allocation24_spill] sm:$0xff]  ;;  %v3576_v34 = vld [vmem:[#allocation25_spill] sm:$0xff] }
 0x20d   :  { %v583_v26 = vadd.f32 %v582_v9, %v3575_v2  ;;  %v1031_v19 = vld [vmem:[%s3533_s3 + $0x20] sm:$0xff]  ;;  %v485_v9 = vadd.f32 %v484_v49, %v3576_v34 }
 0x20e   :  { %1135 = vmatmul.f32.gmra.mxu2 %v3275_v17  ;;  %1194 = vmatmul.f32.gmra.mxu3 %v3275_v17  ;;  %v913_v63 = vadd.f32 %v2872_v58, %v851_v60  ;;  %v914_v0 = vadd.f32 %v2875_v21, %v852_v54 }
 0x20f   :  { %1401 = vmatmul.f32.gmra.mxu0 %v3275_v17  ;;  %1460 = vmatmul.f32.gmra.mxu1 %v3275_v17 }
 0x210   :  { %v969_v46 = vmax.f32 %v913_v63, 0.0  ;;  %v970_v50 = vmax.f32 %v914_v0, 0.0  ;;  %1223 = vmatpush.msra.mxu2 %v1031_v19 }
 0x212   :  { %v588_v15 = vpop.f32.mrf.mxu3 }
 0x213   :  { %v689_v18 = vpop.f32.mrf.mxu0  ;;  %v790_v52 = vpop.f32.mrf.mxu1 }
 0x214   :  { %v853_v12 = vadd.f32 %v689_v18, %v476_v41  ;;  %v854_v8 = vadd.f32 %v790_v52, %v577_v38  ;;  %v487_v41 = vpop.f32.mrf.mxu2 }
 0x216   :  { %v915_v25 = vadd.f32 %v2872_v58, %v853_v12  ;;  %v916_v7 = vadd.f32 %v2875_v21, %v854_v8  ;;  %v1029_v12 = vld [vmem:[%s3533_s3 + $0x10] sm:$0xff]  ;;  %v1030_v8 = vld [vmem:[%s3533_s3 + $0x18] sm:$0xff] }
 0x217   :  { %1224 = vmatpush.msra.mxu2 %v1029_v12  ;;  %1283 = vmatpush.msra.mxu3 %v1030_v8 }
 0x218   :  { %v971_v23 = vmax.f32 %v915_v25, 0.0  ;;  %v972_v10 = vmax.f32 %v916_v7, 0.0  ;;  %v3577_v25 = vld [vmem:[#allocation26_spill] sm:$0xff] }
 0x219   :  { %v586_v7 = vadd.f32 %v585_v20, %v3577_v25 }
 0x21a   :  { %v1005_v35 = vmax.f32 %v969_v46, %v971_v23  ;;  %v1006_v53 = vmax.f32 %v970_v50, %v972_v10  ;;  %v1027_v46 = vld [vmem:[%s3533_s3] sm:$0xff]  ;;  %v1028_v50 = vld [vmem:[%s3533_s3 + $0x8] sm:$0xff] }
 0x21b   :  { %v692_v24 = vpop.f32.mrf.mxu0  ;;  %v793_v32 = vpop.f32.mrf.mxu1  ;;  %1225 = vmatpush.msra.mxu2 %v1027_v46  ;;  %1284 = vmatpush.msra.mxu3 %v1028_v50 }
 0x21c   :  { %v3301_v57 = vmax.f32 %v1005_v35, %v1006_v53  ;;  %v855_v1 = vadd.f32 %v692_v24, %v479_v56  ;;  %v856_v36 = vadd.f32 %v793_v32, %v580_v31  ;;  %v3578_v35 = vld [vmem:[#allocation27_spill] sm:$0xff]  ;;  %v3579_v24 = vld [vmem:[#allocation28_spill] sm:$0xff]  ;;  %v490_v47 = vpop.f32.mrf.mxu2  ;;  %v591_v31 = vpop.f32.mrf.mxu3 }
 0x21d   :  { %v488_v53 = vadd.f32 %v487_v41, %v3578_v35  ;;  %v589_v32 = vadd.f32 %v588_v15, %v3579_v24  ;;  %v2172_v35 = vmov 0.0  }
 0x21e   :  { %1138 = vmatmul.f32.gmra.mxu2 %v3301_v57  ;;  %1197 = vmatmul.f32.gmra.mxu3 %v3301_v57  ;;  %v917_v42 = vadd.f32 %v2872_v58, %v855_v1  ;;  %v918_v62 = vadd.f32 %v2875_v21, %v856_v36 }
 0x21f   :  { %1404 = vmatmul.f32.gmra.mxu0 %v3301_v57  ;;  %1463 = vmatmul.f32.gmra.mxu1 %v3301_v57 }
 0x220   :  { %v973_v54 = vmax.f32 %v917_v42, 0.0  ;;  %v974_v6 = vmax.f32 %v918_v62, 0.0  ;;  %v3581_v62 = vld [vmem:[#allocation30_spill] sm:$0xff] }
 0x223   :  { %v695_v22 = vpop.f32.mrf.mxu0  ;;  %v796_v28 = vpop.f32.mrf.mxu1 }
 0x224   :  { %v857_v48 = vadd.f32 %v695_v22, %v482_v13  ;;  %v858_v5 = vadd.f32 %v796_v28, %v583_v26  ;;  %v3580_v28 = vld [vmem:[#allocation29_spill] sm:$0xff] }
 0x225   :  { %v491_v42 = vadd.f32 %v490_v47, %v3580_v28  ;;  %v1599_v28 = vld [vmem:[#allocation4 + $0x48] sm:$0xff] }
 0x226   :  { %v919_v45 = vadd.f32 %v2872_v58, %v857_v48  ;;  %v920_v60 = vadd.f32 %v2875_v21, %v858_v5  ;;  %v592_v48 = vadd.f32 %v591_v31, %v3581_v62  ;;  %v493_v5 = vpop.f32.mrf.mxu2  ;;  %v1604_v31 = vld [vmem:[#allocation4 + $0x70] sm:$0xff]  ;;  %v1598_v62 = vld [vmem:[#allocation4 + $0x40] sm:$0xff] }
 0x228   :  { %v975_v11 = vmax.f32 %v919_v45, 0.0  ;;  %v976_v44 = vmax.f32 %v920_v60, 0.0  ;;  %v594_v45 = vpop.f32.mrf.mxu3 }
 0x22a   :  { %v1007_v38 = vmax.f32 %v973_v54, %v975_v11  ;;  %v1008_v18 = vmax.f32 %v974_v6, %v976_v44  ;;  %v3582_v6 = vld [vmem:[#allocation8_spill] sm:$0xff]  ;;  %v3583_v44 = vld [vmem:[#allocation9_spill] sm:$0xff] }
 0x22b   :  { %v698_v52 = vpop.f32.mrf.mxu0  ;;  %v799_v63 = vpop.f32.mrf.mxu1  ;;  %v494_v11 = vadd.f32 %v493_v5, %v3582_v6  ;;  %v595_v41 = vadd.f32 %v594_v45, %v3583_v44  ;;  %v1614_v5 = vld [vmem:[#allocation4 + $0xb8] sm:$0xff]  ;;  %v1613_v6 = vld [vmem:[#allocation4 + $0xb0] sm:$0xff]  ;;  %v1612_v44 = vld [vmem:[#allocation4 + $0xa8] sm:$0xff] }
 0x22c   :  { %v3333_v0 = vmax.f32 %v1007_v38, %v1008_v18  ;;  %v859_v23 = vadd.f32 %v698_v52, %v485_v9  ;;  %v860_v10 = vadd.f32 %v799_v63, %v586_v7 }
 0x22e   :  { %1141 = vmatmul.f32.gmra.mxu2 %v3333_v0  ;;  %1200 = vmatmul.f32.gmra.mxu3 %v3333_v0  ;;  %v921_v14 = vadd.f32 %v2872_v58, %v859_v23  ;;  %v922_v40 = vadd.f32 %v2875_v21, %v860_v10 }
 0x22f   :  { %1407 = vmatmul.f32.gmra.mxu0 %v3333_v0  ;;  %1466 = vmatmul.f32.gmra.mxu1 %v3333_v0 }
 0x230   :  { %v977_v1 = vmax.f32 %v921_v14, 0.0  ;;  %v978_v36 = vmax.f32 %v922_v40, 0.0 }
 0x233   :  { %v701_v29 = vpop.f32.mrf.mxu0  ;;  %v802_v3 = vpop.f32.mrf.mxu1 }
 0x234   :  { %v861_v4 = vadd.f32 %v701_v29, %v488_v53  ;;  %v862_v56 = vadd.f32 %v802_v3, %v589_v32 }
 0x236   :  { %v923_v49 = vadd.f32 %v2872_v58, %v861_v4  ;;  %v924_v20 = vadd.f32 %v2875_v21, %v862_v56  ;;  %v1605_v4 = vld [vmem:[#allocation4 + $0x78] sm:$0xff] }
 0x237   :  { %1643 = vmatpush.msrb.mxu3 %v1605_v4 }
 0x238   :  { %v979_v61 = vmax.f32 %v923_v49, 0.0  ;;  %v980_v13 = vmax.f32 %v924_v20, 0.0 }
 0x239   :  { %1644 = vmatpush.msrb.mxu3 %v1604_v31  ;;  %v1676_v31 = vld [vmem:[#allocation4 + $0x160] sm:$0xff] }
 0x23a   :  { %v1009_v2 = vmax.f32 %v977_v1, %v979_v61  ;;  %v1010_v26 = vmax.f32 %v978_v36, %v980_v13  ;;  %v1603_v1 = vld [vmem:[#allocation4 + $0x68] sm:$0xff]  ;;  %v1602_v13 = vld [vmem:[#allocation4 + $0x60] sm:$0xff] }
 0x23b   :  { %v704_v19 = vpop.f32.mrf.mxu0  ;;  %v805_v33 = vpop.f32.mrf.mxu1  ;;  %1645 = vmatpush.msrb.mxu3 %v1603_v1 }
 0x23c   :  { %v3359_v22 = vmax.f32 %v1009_v2, %v1010_v26  ;;  %v863_v60 = vadd.f32 %v704_v19, %v491_v42  ;;  %v864_v54 = vadd.f32 %v805_v33, %v592_v48  ;;  %v1618_v2 = vld [vmem:[#allocation4 + $0xd8] sm:$0xff]  ;;  %v1600_v33 = vld [vmem:[#allocation4 + $0x50] sm:$0xff]  ;;  %v1616_v42 = vld [vmem:[#allocation4 + $0xc8] sm:$0xff] }
 0x23d   :  { %v1601_v26 = vld [vmem:[#allocation4 + $0x58] sm:$0xff]  ;;  %1646 = vmatpush.msrb.mxu3 %v1602_v13  ;;  %v1615_v48 = vld [vmem:[#allocation4 + $0xc0] sm:$0xff]  ;;  %v1674_v13 = vld [vmem:[#allocation4 + $0x150] sm:$0xff] }
 0x23e   :  { %1144 = vmatmul.f32.gmra.mxu2 %v3359_v22  ;;  %1203 = vmatmul.f32.gmra.mxu3 %v3359_v22  ;;  %v925_v18 = vadd.f32 %v2872_v58, %v863_v60  ;;  %v926_v52 = vadd.f32 %v2875_v21, %v864_v54  ;;  %v1596_v54 = vld [vmem:[#allocation4 + $0x30] sm:$0xff] }
 0x23f   :  { %1410 = vmatmul.f32.gmra.mxu0 %v3359_v22  ;;  %1469 = vmatmul.f32.gmra.mxu1 %v3359_v22 }
 0x240   :  { %v981_v9 = vmax.f32 %v925_v18, 0.0  ;;  %v982_v25 = vmax.f32 %v926_v52, 0.0  ;;  %1647 = vmatpush.msrb.mxu3 %v1601_v26  ;;  %v1610_v52 = vld [vmem:[#allocation4 + $0x98] sm:$0xff]  ;;  %v1673_v26 = vld [vmem:[#allocation4 + $0x148] sm:$0xff] }
 0x242   :  { %1648 = vmatpush.msrb.mxu3 %v1600_v33 }
 0x243   :  { %v707_v15 = vpop.f32.mrf.mxu0  ;;  %v808_v38 = vpop.f32.mrf.mxu1 }
 0x244   :  { %v865_v63 = vadd.f32 %v707_v15, %v494_v11  ;;  %v866_v12 = vadd.f32 %v808_v38, %v595_v41  ;;  %1649 = vmatpush.msrb.mxu3 %v1599_v28  ;;  %v1595_v11 = vld [vmem:[#allocation4 + $0x28] sm:$0xff]  ;;  %v1611_v41 = vld [vmem:[#allocation4 + $0xa0] sm:$0xff]  ;;  %v1593_v15 = vld [vmem:[#allocation4 + $0x18] sm:$0xff] }
 0x245   :  { %v1507_v28 = vld [vmem:[%s3534_s4] sm:$0x3] }
 0x246   :  { %v927_v8 = vadd.f32 %v2872_v58, %v865_v63  ;;  %v928_v34 = vadd.f32 %v2875_v21, %v866_v12  ;;  %v3377_v21 = vpop.f32.mrf.mxu2  ;;  %v3379_v58 = vpop.f32.mrf.mxu3  ;;  %1650 = vmatpush.msrb.mxu3 %v1598_v62  ;;  %v1672_v62 = vld [vmem:[#allocation4 + $0x140] sm:$0xff] }
 0x248   :  { %v983_v7 = vmax.f32 %v927_v8, 0.0  ;;  %v984_v46 = vmax.f32 %v928_v34, 0.0  ;;  %v1592_v8 = vld [vmem:[#allocation4 + $0x10] sm:$0xff] }
 0x249   :  { %v1609_v34 = vld [vmem:[#allocation4 + $0x90] sm:$0xff] }
 0x24a   :  { %v1011_v50 = vmax.f32 %v981_v9, %v983_v7  ;;  %v1012_v23 = vmax.f32 %v982_v25, %v984_v46  ;;  %v1591_v9 = vld [vmem:[#allocation4 + $0x8] sm:$0xff]  ;;  %v1590_v7 = vld [vmem:[#allocation4] sm:$0xff] }
 0x24b   :  { %v1378_v38 = vpop.f32.mrf.mxu0  ;;  %v1608_v25 = vld [vmem:[#allocation4 + $0x88] sm:$0xff]  ;;  %v1607_v46 = vld [vmem:[#allocation4 + $0x80] sm:$0xff] }
 0x24c   :  { %v1026_v10 = vmax.f32 %v1011_v50, %v1012_v23  ;;  %v1437_v18 = vpop.f32.mrf.mxu1  ;;  %v1679_v50 = vld [vmem:[#allocation4 + $0x178] sm:$0xff] }
 0x24e   :  { %1147 = vmatmul.f32.gmra.mxu2 %v1026_v10  ;;  %1206 = vmatmul.f32.gmra.mxu3 %v1026_v10  ;;  %v3383_v53 = vpop.f32.mrf.mxu2  ;;  %v3385_v24 = vpop.f32.mrf.mxu3 }
 0x24f   :  { %1413 = vmatmul.f32.gmra.mxu0 %v1026_v10  ;;  %1472 = vmatmul.f32.gmra.mxu1 %v1026_v10 }
 0x254   :  { %v1440_v4 = vpop.f32.mrf.mxu1 }
 0x256   :  { %1226 = vmatmul.f32.vlgmr.msra.gmra.mxu2 %v2172_v35  ;;  %1285 = vmatmul.f32.vlgmr.msra.gmra.mxu3 %v2172_v35  ;;  %v3391_v32 = vpop.f32.mrf.mxu3 }
 0x257   :  { %1416 = vmatmul.f32.gmra.mxu0 %v2172_v35  ;;  %1475 = vmatmul.f32.gmra.mxu1 %v2172_v35  ;;  %v1678_v35 = vld [vmem:[#allocation4 + $0x170] sm:$0xff] }
 0x25e   :  { %1229 = vmatmul.f32.gmra.mxu2 %v2897_v27  ;;  %1288 = vmatmul.f32.gmra.mxu3 %v2897_v27  ;;  %v3389_v27 = vpop.f32.mrf.mxu2  ;;  %v3397_v29 = vpop.f32.mrf.mxu3 }
 0x266   :  { %1232 = vmatmul.f32.gmra.mxu2 %v2931_v39  ;;  %1291 = vmatmul.f32.gmra.mxu3 %v2931_v39  ;;  %v3395_v39 = vpop.f32.mrf.mxu2  ;;  %v3403_v3 = vpop.f32.mrf.mxu3 }
 0x26e   :  { %1235 = vmatmul.f32.gmra.mxu2 %v2983_v59  ;;  %1294 = vmatmul.f32.gmra.mxu3 %v2983_v59  ;;  %v3401_v59 = vpop.f32.mrf.mxu2  ;;  %v3409_v14 = vpop.f32.mrf.mxu3 }
 0x276   :  { %1238 = vmatmul.f32.gmra.mxu2 %v3057_v16  ;;  %1297 = vmatmul.f32.gmra.mxu3 %v3057_v16  ;;  %v3407_v16 = vpop.f32.mrf.mxu2 }
 0x27e   :  { %1241 = vmatmul.f32.gmra.mxu2 %v3101_v51  ;;  %1300 = vmatmul.f32.gmra.mxu3 %v3101_v51  ;;  %v1622_v51 = vld [vmem:[#allocation4 + $0xf8] sm:$0xff]  ;;  %v3413_v40 = vpop.f32.mrf.mxu2 }
 0x27f   :  { %1623 = vmatpush.msrb.mxu2 %v1622_v51  ;;  %v1381_v51 = vpop.f32.mrf.mxu0 }
 0x286   :  { %1244 = vmatmul.f32.gmra.mxu2 %v3131_v37  ;;  %1303 = vmatmul.f32.gmra.mxu3 %v3131_v37  ;;  %v3415_v37 = vpop.f32.mrf.mxu3  ;;  %v3419_v56 = vpop.f32.mrf.mxu2 }
 0x287   :  { %v3456_v33 = vpop.f32.mrf.mxu0 }
 0x28e   :  { %1247 = vmatmul.f32.gmra.mxu2 %v3171_v43  ;;  %1306 = vmatmul.f32.gmra.mxu3 %v3171_v43  ;;  %v1621_v43 = vld [vmem:[#allocation4 + $0xf0] sm:$0xff]  ;;  %v3421_v47 = vpop.f32.mrf.mxu3  ;;  %v3425_v49 = vpop.f32.mrf.mxu2 }
 0x28f   :  { %1624 = vmatpush.msrb.mxu2 %v1621_v43  ;;  %v1677_v43 = vld [vmem:[#allocation4 + $0x168] sm:$0xff] }
 0x296   :  { %1250 = vmatmul.f32.gmra.mxu2 %v3213_v55  ;;  %1309 = vmatmul.f32.gmra.mxu3 %v3213_v55  ;;  %v1620_v55 = vld [vmem:[#allocation4 + $0xe8] sm:$0xff]  ;;  %v3427_v20 = vpop.f32.mrf.mxu3  ;;  %v3431_v36 = vpop.f32.mrf.mxu2 }
 0x297   :  { %1625 = vmatpush.msrb.mxu2 %v1620_v55  ;;  %v1675_v55 = vld [vmem:[#allocation4 + $0x158] sm:$0xff] }
 0x29e   :  { %1253 = vmatmul.f32.gmra.mxu2 %v3245_v30  ;;  %1312 = vmatmul.f32.gmra.mxu3 %v3245_v30  ;;  %v1619_v30 = vld [vmem:[#allocation4 + $0xe0] sm:$0xff]  ;;  %v3433_v61 = vpop.f32.mrf.mxu3 }
 0x29f   :  { %1626 = vmatpush.msrb.mxu2 %v1619_v30 }
 0x2a1   :  { %1627 = vmatpush.msrb.mxu2 %v1618_v2 }
 0x2a6   :  { %1256 = vmatmul.f32.gmra.mxu2 %v3275_v17  ;;  %1315 = vmatmul.f32.gmra.mxu3 %v3275_v17  ;;  %v3437_v17 = vpop.f32.mrf.mxu2  ;;  %v3439_v19 = vpop.f32.mrf.mxu3 }
 0x2ae   :  { %1259 = vmatmul.f32.gmra.mxu2 %v3301_v57  ;;  %1318 = vmatmul.f32.gmra.mxu3 %v3301_v57  ;;  %v1617_v57 = vld [vmem:[#allocation4 + $0xd0] sm:$0xff] }
 0x2af   :  { %1628 = vmatpush.msrb.mxu2 %v1617_v57  ;;  %v3458_v57 = vpop.f32.mrf.mxu1 }
 0x2b1   :  { %1629 = vmatpush.msrb.mxu2 %v1616_v42  ;;  %v3443_v45 = vpop.f32.mrf.mxu2  ;;  %v3445_v60 = vpop.f32.mrf.mxu3 }
 0x2b3   :  { %1630 = vmatpush.msrb.mxu2 %v1615_v48 }
 0x2b5   :  { %1631 = vmatpush.msrb.mxu2 %v1614_v5  ;;  %v1671_v5 = vld [vmem:[#allocation4 + $0x138] sm:$0xff] }
 0x2b6   :  { %1262 = vmatmul.f32.gmra.mxu2 %v3333_v0  ;;  %1321 = vmatmul.f32.gmra.mxu3 %v3333_v0  ;;  %v1597_v0 = vld [vmem:[#allocation4 + $0x38] sm:$0xff] }
 0x2b7   :  { %1651 = vmatpush.msrb.mxu3 %v1597_v0  ;;  %1632 = vmatpush.msrb.mxu2 %v1613_v6  ;;  %v3464_v0 = vperm.slane %v1507_v28, 0  ;;  %v3466_v6 = vperm.slane %v1507_v28, 1 }
 0x2b9   :  { %1652 = vmatpush.msrb.mxu3 %v1596_v54  ;;  %1633 = vmatpush.msrb.mxu2 %v1612_v44  ;;  %v1717_v54 = vld [vmem:[#allocation4 + $0x1f8] sm:$0xff] }
 0x2bb   :  { %1653 = vmatpush.msrb.mxu3 %v1595_v11  ;;  %1634 = vmatpush.msrb.mxu2 %v1611_v41  ;;  %v1716_v41 = vld [vmem:[#allocation4 + $0x1f0] sm:$0xff] }
 0x2bd   :  { %1635 = vmatpush.msrb.mxu2 %v1610_v52  ;;  %v1669_v52 = vld [vmem:[#allocation4 + $0x128] sm:$0xff] }
 0x2be   :  { %1265 = vmatmul.f32.gmra.mxu2 %v3359_v22  ;;  %1324 = vmatmul.f32.gmra.mxu3 %v3359_v22  ;;  %v1594_v22 = vld [vmem:[#allocation4 + $0x20] sm:$0xff] }
 0x2bf   :  { %1654 = vmatpush.msrb.mxu3 %v1594_v22  ;;  %1636 = vmatpush.msrb.mxu2 %v1609_v34  ;;  %v1670_v22 = vld [vmem:[#allocation4 + $0x130] sm:$0xff] }
 0x2c1   :  { %v3447_v63 = vpop.f32.mrf.mxu2  ;;  %v3449_v12 = vpop.f32.mrf.mxu3  ;;  %1655 = vmatpush.msrb.mxu3 %v1593_v15  ;;  %1637 = vmatpush.msrb.mxu2 %v1608_v25  ;;  %v1668_v25 = vld [vmem:[#allocation4 + $0x120] sm:$0xff] }
 0x2c3   :  { %1656 = vmatpush.msrb.mxu3 %v1592_v8  ;;  %1638 = vmatpush.msrb.mxu2 %v1607_v46  ;;  %v1715_v8 = vld [vmem:[#allocation4 + $0x1e8] sm:$0xff]  ;;  %v1387_v46 = vpop.f32.mrf.mxu0 }
 0x2c5   :  { %1657 = vmatpush.msrb.mxu3 %v1591_v9  ;;  %1680 = vmatpush.msra.mxu2 %v1679_v50  ;;  %v1446_v50 = vpop.f32.mrf.mxu1 }
 0x2c7   :  { %1658 = vmatpush.msrb.mxu3 %v1590_v7  ;;  %1681 = vmatpush.msra.mxu2 %v1678_v35  ;;  %v1714_v7 = vld [vmem:[#allocation4 + $0x1e0] sm:$0xff]  ;;  %v1667_v35 = vld [vmem:[#allocation4 + $0x118] sm:$0xff] }
 0x2c9   :  { %1682 = vmatpush.msra.mxu2 %v1677_v43  ;;  %1718 = vmatpush.msra.mxu3 %v1717_v54  ;;  %v1713_v43 = vld [vmem:[#allocation4 + $0x1d8] sm:$0xff] }
 0x2cb   :  { %1683 = vmatpush.msra.mxu2 %v1676_v31  ;;  %1719 = vmatpush.msra.mxu3 %v1716_v41 }
 0x2cd   :  { %1684 = vmatpush.msra.mxu2 %v1675_v55  ;;  %1720 = vmatpush.msra.mxu3 %v1715_v8  ;;  %v1449_v41 = vpop.f32.mrf.mxu1 }
 0x2cf   :  { %1685 = vmatpush.msra.mxu2 %v1674_v13  ;;  %1721 = vmatpush.msra.mxu3 %v1714_v7  ;;  %v1666_v13 = vld [vmem:[#allocation4 + $0x110] sm:$0xff] }
 0x2d1   :  { %v3451_v23 = vpop.f32.mrf.mxu2  ;;  %v3453_v10 = vpop.f32.mrf.mxu3  ;;  %1686 = vmatpush.msra.mxu2 %v1673_v26  ;;  %1722 = vmatpush.msra.mxu3 %v1713_v43 }
 0x2d3   :  { %1687 = vmatpush.msra.mxu2 %v1672_v62  ;;  %v1711_v62 = vld [vmem:[#allocation4 + $0x1c8] sm:$0xff] }
 0x2d5   :  { %1688 = vmatpush.msra.mxu2 %v1671_v5 }
 0x2d7   :  { %1689 = vmatpush.msra.mxu2 %v1670_v22  ;;  %v1390_v22 = vpop.f32.mrf.mxu0 }
 0x2d9   :  { %v1227_v1 = vpop.f32.mrf.mxu2  ;;  %v1286_v30 = vpop.f32.mrf.mxu3  ;;  %1690 = vmatpush.msra.mxu2 %v1669_v52 }
 0x2da   :  { %v1228_v2 = vadd.f32 %v1227_v1, %v3377_v21  ;;  %v1287_v42 = vadd.f32 %v1286_v30, %v3379_v58 }
 0x2db   :  { %1691 = vmatpush.msra.mxu2 %v1668_v25 }
 0x2dc   :  { %v1479_v48 = vadd.f32 %v1378_v38, %v1228_v2  ;;  %v1480_v21 = vadd.f32 %v1437_v18, %v1287_v42  ;;  %v1712_v2 = vld [vmem:[#allocation4 + $0x1d0] sm:$0xff]  ;;  %v1665_v42 = vld [vmem:[#allocation4 + $0x108] sm:$0xff] }
 0x2dd   :  { %1692 = vmatpush.msra.mxu2 %v1667_v35  ;;  %1723 = vmatpush.msra.mxu3 %v1712_v2 }
 0x2de   :  { %v1513_v38 = vadd.f32 %v3464_v0, %v1479_v48  ;;  %v1514_v18 = vadd.f32 %v3466_v6, %v1480_v21  ;;  %v1664_v21 = vld [vmem:[#allocation4 + $0x100] sm:$0xff] }
 0x2df   :  { %1693 = vmatpush.msra.mxu2 %v1666_v13  ;;  %1724 = vmatpush.msra.mxu3 %v1711_v62  ;;  %v1754_v62 = vld [vmem:[#allocation4 + $0x270] sm:$0xff] }
 0x2e0   :  { %v1541_v31 = vmax.f32 %v1513_v38, 0.0  ;;  %v1542_v55 = vmax.f32 %v1514_v18, 0.0  ;;  %v1707_v18 = vld [vmem:[#allocation4 + $0x1a8] sm:$0xff] }
 0x2e1   :  { %v1230_v11 = vpop.f32.mrf.mxu2  ;;  %v1289_v44 = vpop.f32.mrf.mxu3  ;;  %1694 = vmatpush.msra.mxu2 %v1665_v42  ;;  %v1702_v42 = vld [vmem:[#allocation4 + $0x180] sm:$0xff] }
 0x2e2   :  { %v1231_v15 = vadd.f32 %v1230_v11, %v3383_v53  ;;  %v1290_v58 = vadd.f32 %v1289_v44, %v3385_v24  ;;  %v1710_v11 = vld [vmem:[#allocation4 + $0x1c0] sm:$0xff]  ;;  %v1709_v44 = vld [vmem:[#allocation4 + $0x1b8] sm:$0xff] }
 0x2e3   :  { %1695 = vmatpush.msra.mxu2 %v1664_v21  ;;  %1725 = vmatpush.msra.mxu3 %v1710_v11  ;;  %v1753_v21 = vld [vmem:[#allocation4 + $0x268] sm:$0xff] }
 0x2e4   :  { %v1481_v34 = vadd.f32 %v1381_v51, %v1231_v15  ;;  %v1482_v9 = vadd.f32 %v1440_v4, %v1290_v58 }
 0x2e5   :  { %1726 = vmatpush.msra.mxu3 %v1709_v44 }
 0x2e6   :  { %v1515_v53 = vadd.f32 %v3464_v0, %v1481_v34  ;;  %v1516_v24 = vadd.f32 %v3466_v6, %v1482_v9 }
 0x2e8   :  { %v1543_v1 = vmax.f32 %v1515_v53, 0.0  ;;  %v1544_v30 = vmax.f32 %v1516_v24, 0.0  ;;  %v1705_v24 = vld [vmem:[#allocation4 + $0x198] sm:$0xff] }
 0x2e9   :  { %v1233_v51 = vpop.f32.mrf.mxu2  ;;  %v1292_v4 = vpop.f32.mrf.mxu3 }
 0x2ea   :  { %v1569_v26 = vmax.f32 %v1541_v31, %v1543_v1  ;;  %v1570_v28 = vmax.f32 %v1542_v55, %v1544_v30  ;;  %v1234_v5 = vadd.f32 %v1233_v51, %v3389_v27  ;;  %v1293_v54 = vadd.f32 %v1292_v4, %v3391_v32  ;;  %v1708_v27 = vld [vmem:[#allocation4 + $0x1b0] sm:$0xff]  ;;  %v1393_v30 = vpop.f32.mrf.mxu0  ;;  %v1452_v51 = vpop.f32.mrf.mxu1  ;;  %v1703_v4 = vld [vmem:[#allocation4 + $0x188] sm:$0xff] }
 0x2eb   :  { %1727 = vmatpush.msra.mxu3 %v1708_v27  ;;  %v1704_v1 = vld [vmem:[#allocation4 + $0x190] sm:$0xff] }
 0x2ec   :  { %v1583_v48 = vmax.f32 %v1569_v26, %v1570_v28  ;;  %v1483_v15 = vadd.f32 %v3456_v33, %v1234_v5  ;;  %v1484_v58 = vadd.f32 %v3458_v57, %v1293_v54  ;;  %v1706_v33 = vld [vmem:[#allocation4 + $0x1a0] sm:$0xff]  ;;  %v1755_v28 = vld [vmem:[#allocation4 + $0x278] sm:$0xff] }
 0x2ed   :  { %1728 = vmatpush.msra.mxu3 %v1707_v18  ;;  %v1751_v18 = vld [vmem:[#allocation4 + $0x258] sm:$0xff] }
 0x2ee   :  { %1659 = vmatmul.f32.vlgmr.msrb.gmra.mxu3 %v1583_v48  ;;  %v1517_v34 = vadd.f32 %v3464_v0, %v1483_v15  ;;  %v1518_v9 = vadd.f32 %v3466_v6, %v1484_v58  ;;  %v1793_v48 = vld [vmem:[#allocation4 + $0x2f8] sm:$0xff]  ;;  %v1792_v15 = vld [vmem:[#allocation4 + $0x2f0] sm:$0xff]  ;;  %v1752_v58 = vld [vmem:[#allocation4 + $0x260] sm:$0xff] }
 0x2ef   :  { %1729 = vmatpush.msra.mxu3 %v1706_v33 }
 0x2f0   :  { %v1545_v35 = vmax.f32 %v1517_v34, 0.0  ;;  %v1790_v34 = vld [vmem:[#allocation4 + $0x2e0] sm:$0xff] }
 0x2f1   :  { %v1236_v38 = vpop.f32.mrf.mxu2  ;;  %v1295_v52 = vpop.f32.mrf.mxu3  ;;  %1730 = vmatpush.msra.mxu3 %v1705_v24  ;;  %v1749_v24 = vld [vmem:[#allocation4 + $0x248] sm:$0xff] }
 0x2f2   :  { %v1237_v32 = vadd.f32 %v1236_v38, %v3395_v39  ;;  %v1296_v8 = vadd.f32 %v1295_v52, %v3397_v29  ;;  %v1546_v39 = vmax.f32 %v1518_v9, 0.0  ;;  %v1791_v38 = vld [vmem:[#allocation4 + $0x2e8] sm:$0xff]  ;;  %v1396_v52 = vpop.f32.mrf.mxu0  ;;  %v1455_v27 = vpop.f32.mrf.mxu1  ;;  %v1750_v9 = vld [vmem:[#allocation4 + $0x250] sm:$0xff] }
 0x2f3   :  { %1731 = vmatpush.msra.mxu3 %v1704_v1  ;;  %v1787_v1 = vld [vmem:[#allocation4 + $0x2c8] sm:$0xff] }
 0x2f4   :  { %v1485_v25 = vadd.f32 %v1387_v46, %v1237_v32  ;;  %v1486_v7 = vadd.f32 %v1446_v50, %v1296_v8 }
 0x2f5   :  { %1732 = vmatpush.msra.mxu3 %v1703_v4  ;;  %v1786_v4 = vld [vmem:[#allocation4 + $0x2c0] sm:$0xff] }
 0x2f6   :  { %v1519_v57 = vadd.f32 %v3464_v0, %v1485_v25  ;;  %v1520_v53 = vadd.f32 %v3466_v6, %v1486_v7  ;;  %v1789_v25 = vld [vmem:[#allocation4 + $0x2d8] sm:$0xff] }
 0x2f7   :  { %1733 = vmatpush.msra.mxu3 %v1702_v42 }
 0x2f8   :  { %v1547_v43 = vmax.f32 %v1519_v57, 0.0  ;;  %v1548_v29 = vmax.f32 %v1520_v53, 0.0 }
 0x2f9   :  { %v1239_v31 = vpop.f32.mrf.mxu2  ;;  %v1298_v55 = vpop.f32.mrf.mxu3  ;;  %1794 = vmatpush.msrb.mxu3 %v1793_v48  ;;  %v1745_v48 = vld [vmem:[#allocation4 + $0x228] sm:$0xff] }
 0x2fa   :  { %v1571_v46 = vmax.f32 %v1545_v35, %v1547_v43  ;;  %v1572_v50 = vmax.f32 %v1546_v39, %v1548_v29  ;;  %v1240_v2 = vadd.f32 %v1239_v31, %v3401_v59  ;;  %v1299_v26 = vadd.f32 %v1298_v55, %v3403_v3  ;;  %v1788_v43 = vld [vmem:[#allocation4 + $0x2d0] sm:$0xff]  ;;  %v1748_v55 = vld [vmem:[#allocation4 + $0x240] sm:$0xff] }
 0x2fb   :  { %1795 = vmatpush.msrb.mxu3 %v1792_v15 }
 0x2fc   :  { %v1584_v13 = vmax.f32 %v1571_v46, %v1572_v50  ;;  %v1487_v5 = vadd.f32 %v1390_v22, %v1240_v2  ;;  %v1488_v54 = vadd.f32 %v1449_v41, %v1299_v26  ;;  %v1747_v50 = vld [vmem:[#allocation4 + $0x238] sm:$0xff]  ;;  %v1458_v2 = vpop.f32.mrf.mxu1  ;;  %v1746_v26 = vld [vmem:[#allocation4 + $0x230] sm:$0xff] }
 0x2fd   :  { %1796 = vmatpush.msrb.mxu3 %v1791_v38  ;;  %v1743_v38 = vld [vmem:[#allocation4 + $0x218] sm:$0xff] }
 0x2fe   :  { %1639 = vmatmul.f32.vlgmr.msrb.gmra.mxu2 %v1584_v13  ;;  %v1521_v32 = vadd.f32 %v3464_v0, %v1487_v5  ;;  %v1522_v22 = vadd.f32 %v3466_v6, %v1488_v54  ;;  %v1399_v13 = vpop.f32.mrf.mxu0 }
 0x2ff   :  { %1756 = vmatpush.msrb.mxu2 %v1755_v28  ;;  %1797 = vmatpush.msrb.mxu3 %v1790_v34  ;;  %v1785_v28 = vld [vmem:[#allocation4 + $0x2b8] sm:$0xff] }
 0x300   :  { %v1549_v7 = vmax.f32 %v1521_v32, 0.0  ;;  %v1550_v33 = vmax.f32 %v1522_v22, 0.0  ;;  %v1742_v32 = vld [vmem:[#allocation4 + $0x210] sm:$0xff] }
 0x301   :  { %v1242_v11 = vpop.f32.mrf.mxu2  ;;  %v1301_v44 = vpop.f32.mrf.mxu3  ;;  %1757 = vmatpush.msrb.mxu2 %v1754_v62  ;;  %1798 = vmatpush.msrb.mxu3 %v1789_v25 }
 0x302   :  { %v1243_v59 = vadd.f32 %v1242_v11, %v3407_v16  ;;  %v1302_v3 = vadd.f32 %v1301_v44, %v3409_v14  ;;  %v1744_v11 = vld [vmem:[#allocation4 + $0x220] sm:$0xff]  ;;  %v1783_v44 = vld [vmem:[#allocation4 + $0x2a8] sm:$0xff] }
 0x303   :  { %1758 = vmatpush.msrb.mxu2 %v1753_v21  ;;  %1799 = vmatpush.msrb.mxu3 %v1788_v43 }
 0x304   :  { %v1489_v41 = vadd.f32 %v1393_v30, %v1243_v59  ;;  %v1490_v8 = vadd.f32 %v1452_v51, %v1302_v3 }
 0x305   :  { %1759 = vmatpush.msrb.mxu2 %v1752_v58  ;;  %1800 = vmatpush.msrb.mxu3 %v1787_v1  ;;  %v1829_v1 = vld [vmem:[#allocation4 + $0x368] sm:$0xff] }
 0x306   :  { %v1523_v16 = vadd.f32 %v3464_v0, %v1489_v41  ;;  %v1524_v14 = vadd.f32 %v3466_v6, %v1490_v8  ;;  %v1402_v22 = vpop.f32.mrf.mxu0  ;;  %v1461_v41 = vpop.f32.mrf.mxu1 }
 0x307   :  { %1760 = vmatpush.msrb.mxu2 %v1751_v18  ;;  %1801 = vmatpush.msrb.mxu3 %v1786_v4 }
 0x308   :  { %v1551_v57 = vmax.f32 %v1523_v16, 0.0  ;;  %v1552_v53 = vmax.f32 %v1524_v14, 0.0  ;;  %v1741_v14 = vld [vmem:[#allocation4 + $0x208] sm:$0xff] }
 0x309   :  { %v1245_v35 = vpop.f32.mrf.mxu2  ;;  %v1304_v39 = vpop.f32.mrf.mxu3  ;;  %1761 = vmatpush.msrb.mxu2 %v1750_v9  ;;  %1802 = vmatpush.msrb.mxu3 %v1785_v28 }
 0x30a   :  { %v1573_v29 = vmax.f32 %v1549_v7, %v1551_v57  ;;  %v1574_v31 = vmax.f32 %v1550_v33, %v1552_v53  ;;  %v1246_v51 = vadd.f32 %v1245_v35, %v3413_v40  ;;  %v1305_v46 = vadd.f32 %v1304_v39, %v3415_v37  ;;  %v1784_v40 = vld [vmem:[#allocation4 + $0x2b0] sm:$0xff]  ;;  %v1740_v53 = vld [vmem:[#allocation4 + $0x200] sm:$0xff]  ;;  %v1779_v35 = vld [vmem:[#allocation4 + $0x288] sm:$0xff] }
 0x30b   :  { %1762 = vmatpush.msrb.mxu2 %v1749_v24  ;;  %1803 = vmatpush.msrb.mxu3 %v1784_v40  ;;  %v1780_v7 = vld [vmem:[#allocation4 + $0x290] sm:$0xff]  ;;  %v1831_v24 = vld [vmem:[#allocation4 + $0x378] sm:$0xff] }
 0x30c   :  { %v1585_v30 = vmax.f32 %v1573_v29, %v1574_v31  ;;  %v1491_v42 = vadd.f32 %v1396_v52, %v1246_v51  ;;  %v1492_v62 = vadd.f32 %v1455_v27, %v1305_v46  ;;  %v1782_v52 = vld [vmem:[#allocation4 + $0x2a0] sm:$0xff]  ;;  %v1830_v31 = vld [vmem:[#allocation4 + $0x370] sm:$0xff] }
 0x30d   :  { %1763 = vmatpush.msrb.mxu2 %v1748_v55  ;;  %1804 = vmatpush.msrb.mxu3 %v1783_v44  ;;  %v1778_v55 = vld [vmem:[#allocation4 + $0x280] sm:$0xff] }
 0x30e   :  { %1696 = vmatmul.f32.vlgmr.msra.gmra.mxu2 %v1585_v30  ;;  %v1525_v15 = vadd.f32 %v3464_v0, %v1491_v42  ;;  %v1526_v59 = vadd.f32 %v3466_v6, %v1492_v62  ;;  %v1405_v30 = vpop.f32.mrf.mxu0  ;;  %v1464_v51 = vpop.f32.mrf.mxu1 }
 0x30f   :  { %1764 = vmatpush.msrb.mxu2 %v1747_v50  ;;  %1805 = vmatpush.msrb.mxu3 %v1782_v52 }
 0x310   :  { %v1553_v8 = vmax.f32 %v1525_v15, 0.0  ;;  %v1554_v18 = vmax.f32 %v1526_v59, 0.0 }
 0x311   :  { %v1248_v5 = vpop.f32.mrf.mxu2  ;;  %v1307_v54 = vpop.f32.mrf.mxu3  ;;  %1765 = vmatpush.msrb.mxu2 %v1746_v26  ;;  %v1827_v26 = vld [vmem:[#allocation4 + $0x358] sm:$0xff] }
 0x312   :  { %v1249_v37 = vadd.f32 %v1248_v5, %v3419_v56  ;;  %v1308_v21 = vadd.f32 %v1307_v54, %v3421_v47  ;;  %v1781_v47 = vld [vmem:[#allocation4 + $0x298] sm:$0xff]  ;;  %v1826_v5 = vld [vmem:[#allocation4 + $0x350] sm:$0xff] }
 0x313   :  { %1766 = vmatpush.msrb.mxu2 %v1745_v48  ;;  %1806 = vmatpush.msrb.mxu3 %v1781_v47  ;;  %v1823_v47 = vld [vmem:[#allocation4 + $0x338] sm:$0xff] }
 0x314   :  { %v1493_v3 = vadd.f32 %v1399_v13, %v1249_v37  ;;  %v1494_v58 = vadd.f32 %v1458_v2, %v1308_v21  ;;  %v1828_v2 = vld [vmem:[#allocation4 + $0x360] sm:$0xff]  ;;  %v1825_v37 = vld [vmem:[#allocation4 + $0x348] sm:$0xff] }
 0x315   :  { %1767 = vmatpush.msrb.mxu2 %v1744_v11  ;;  %1807 = vmatpush.msrb.mxu3 %v1780_v7 }
 0x316   :  { %v1527_v27 = vadd.f32 %v3464_v0, %v1493_v3  ;;  %v1528_v56 = vadd.f32 %v3466_v6, %v1494_v58  ;;  %v1408_v21 = vpop.f32.mrf.mxu0  ;;  %v1824_v58 = vld [vmem:[#allocation4 + $0x340] sm:$0xff] }
 0x317   :  { %1768 = vmatpush.msrb.mxu2 %v1743_v38  ;;  %1808 = vmatpush.msrb.mxu3 %v1779_v35 }
 0x318   :  { %v1555_v34 = vmax.f32 %v1527_v27, 0.0  ;;  %v1556_v16 = vmax.f32 %v1528_v56, 0.0 }
 0x319   :  { %v1251_v9 = vpop.f32.mrf.mxu2  ;;  %v1310_v25 = vpop.f32.mrf.mxu3  ;;  %1769 = vmatpush.msrb.mxu2 %v1742_v32  ;;  %1809 = vmatpush.msrb.mxu3 %v1778_v55 }
 0x31a   :  { %v1575_v33 = vmax.f32 %v1553_v8, %v1555_v34  ;;  %v1576_v57 = vmax.f32 %v1554_v18, %v1556_v16  ;;  %v1252_v43 = vadd.f32 %v1251_v9, %v3425_v49  ;;  %v1311_v29 = vadd.f32 %v1310_v25, %v3427_v20  ;;  %v1821_v16 = vld [vmem:[#allocation4 + $0x328] sm:$0xff] }
 0x31b   :  { %1770 = vmatpush.msrb.mxu2 %v1741_v14 }
 0x31c   :  { %v1586_v39 = vmax.f32 %v1575_v33, %v1576_v57  ;;  %v1495_v46 = vadd.f32 %v1402_v22, %v1252_v43  ;;  %v1496_v50 = vadd.f32 %v1461_v41, %v1311_v29  ;;  %v1822_v22 = vld [vmem:[#allocation4 + $0x330] sm:$0xff] }
 0x31d   :  { %1771 = vmatpush.msrb.mxu2 %v1740_v53  ;;  %v1818_v43 = vld [vmem:[#allocation4 + $0x310] sm:$0xff] }
 0x31e   :  { %1734 = vmatmul.f32.vlgmr.msra.gmra.mxu3 %v1586_v39  ;;  %v1529_v28 = vadd.f32 %v3464_v0, %v1495_v46  ;;  %v1530_v42 = vadd.f32 %v3466_v6, %v1496_v50  ;;  %v1411_v41 = vpop.f32.mrf.mxu0 }
 0x31f   :  { %1832 = vmatpush.msra.mxu2 %v1831_v24  ;;  %v1819_v24 = vld [vmem:[#allocation4 + $0x318] sm:$0xff] }
 0x320   :  { %v1557_v11 = vmax.f32 %v1529_v28, 0.0 }
 0x321   :  { %1833 = vmatpush.msra.mxu2 %v1830_v31  ;;  %v1254_v4 = vpop.f32.mrf.mxu2  ;;  %v1313_v13 = vpop.f32.mrf.mxu3 }
 0x322   :  { %v1255_v49 = vadd.f32 %v1254_v4, %v3431_v36  ;;  %v1314_v20 = vadd.f32 %v1313_v13, %v3433_v61  ;;  %v1467_v36 = vpop.f32.mrf.mxu1  ;;  %v1558_v61 = vmax.f32 %v1530_v42, 0.0  ;;  %v1816_v13 = vld [vmem:[#allocation4 + $0x300] sm:$0xff] }
 0x323   :  { %1834 = vmatpush.msra.mxu2 %v1829_v1 }
 0x324   :  { %v1497_v62 = vadd.f32 %v1405_v30, %v1255_v49  ;;  %v1498_v48 = vadd.f32 %v1464_v51, %v1314_v20  ;;  %v1817_v30 = vld [vmem:[#allocation4 + $0x308] sm:$0xff] }
 0x325   :  { %1835 = vmatpush.msra.mxu2 %v1828_v2 }
 0x326   :  { %v1531_v54 = vadd.f32 %v3464_v0, %v1497_v62  ;;  %v1532_v40 = vadd.f32 %v3466_v6, %v1498_v48  ;;  %v1414_v29 = vpop.f32.mrf.mxu0 }
 0x327   :  { %1836 = vmatpush.msra.mxu2 %v1827_v26 }
 0x328   :  { %v1559_v44 = vmax.f32 %v1531_v54, 0.0  ;;  %v1560_v15 = vmax.f32 %v1532_v40, 0.0 }
 0x329   :  { %1837 = vmatpush.msra.mxu2 %v1826_v5  ;;  %v1257_v59 = vpop.f32.mrf.mxu2  ;;  %v1316_v3 = vpop.f32.mrf.mxu3 }
 0x32a   :  { %v1577_v38 = vmax.f32 %v1557_v11, %v1559_v44  ;;  %v1578_v52 = vmax.f32 %v1558_v61, %v1560_v15  ;;  %v1258_v56 = vadd.f32 %v1257_v59, %v3437_v17  ;;  %v1317_v32 = vadd.f32 %v1316_v3, %v3439_v19  ;;  %v1470_v8 = vpop.f32.mrf.mxu1  ;;  %v1820_v17 = vld [vmem:[#allocation4 + $0x320] sm:$0xff] }
 0x32b   :  { %1838 = vmatpush.msra.mxu2 %v1825_v37 }
 0x32c   :  { %v1587_v27 = vmax.f32 %v1577_v38, %v1578_v52  ;;  %v1499_v18 = vadd.f32 %v1408_v21, %v1258_v56  ;;  %v1500_v34 = vadd.f32 %v1467_v36, %v1317_v32 }
 0x32d   :  { %1839 = vmatpush.msra.mxu2 %v1824_v58 }
 0x32e   :  { %1772 = vmatmul.f32.vlgmr.msrb.gmra.mxu2 %v1587_v27  ;;  %v1533_v19 = vadd.f32 %v3464_v0, %v1499_v18  ;;  %v1534_v33 = vadd.f32 %v3466_v6, %v1500_v34  ;;  %v1417_v42 = vpop.f32.mrf.mxu0 }
 0x32f   :  { %1840 = vmatpush.msra.mxu2 %v1823_v47 }
 0x330   :  { %v1561_v31 = vmax.f32 %v1533_v19, 0.0 }
 0x331   :  { %v1260_v14 = vpop.f32.mrf.mxu2  ;;  %v1319_v9 = vpop.f32.mrf.mxu3  ;;  %1841 = vmatpush.msra.mxu2 %v1822_v22 }
 0x332   :  { %v1261_v25 = vadd.f32 %v1260_v14, %v3443_v45  ;;  %v1320_v7 = vadd.f32 %v1319_v9, %v3445_v60  ;;  %v1473_v45 = vpop.f32.mrf.mxu1  ;;  %v1562_v60 = vmax.f32 %v1534_v33, 0.0 }
 0x333   :  { %1842 = vmatpush.msra.mxu2 %v1821_v16 }
 0x334   :  { %v1501_v57 = vadd.f32 %v1411_v41, %v1261_v25  ;;  %v1502_v53 = vadd.f32 %v1470_v8, %v1320_v7 }
 0x335   :  { %1843 = vmatpush.msra.mxu2 %v1820_v17 }
 0x336   :  { %v1535_v35 = vadd.f32 %v3464_v0, %v1501_v57  ;;  %v1536_v39 = vadd.f32 %v3466_v6, %v1502_v53 }
 0x337   :  { %1844 = vmatpush.msra.mxu2 %v1819_v24 }
 0x338   :  { %v1563_v55 = vmax.f32 %v1535_v35, 0.0  ;;  %v1564_v1 = vmax.f32 %v1536_v39, 0.0 }
 0x339   :  { %v1263_v51 = vpop.f32.mrf.mxu2  ;;  %v1322_v46 = vpop.f32.mrf.mxu3  ;;  %1845 = vmatpush.msra.mxu2 %v1818_v43 }
 0x33a   :  { %v1579_v50 = vmax.f32 %v1561_v31, %v1563_v55  ;;  %v1580_v4 = vmax.f32 %v1562_v60, %v1564_v1  ;;  %v1264_v49 = vadd.f32 %v1263_v51, %v3447_v63  ;;  %v1323_v20 = vadd.f32 %v1322_v46, %v3449_v12  ;;  %v1476_v62 = vpop.f32.mrf.mxu1 }
 0x33b   :  { %1846 = vmatpush.msra.mxu2 %v1817_v30 }
 0x33c   :  { %v1588_v2 = vmax.f32 %v1579_v50, %v1580_v4  ;;  %v1503_v26 = vadd.f32 %v1414_v29, %v1264_v49  ;;  %v1504_v28 = vadd.f32 %v1473_v45, %v1323_v20 }
 0x33d   :  { %1847 = vmatpush.msra.mxu2 %v1816_v13 }
 0x33e   :  { %1810 = vmatmul.f32.vlgmr.msrb.gmra.mxu3 %v1588_v2  ;;  %v1537_v37 = vadd.f32 %v3464_v0, %v1503_v26  ;;  %v1538_v21 = vadd.f32 %v3466_v6, %v1504_v28 }
 0x340   :  { %v1565_v61 = vmax.f32 %v1537_v37, 0.0  ;;  %v1566_v44 = vmax.f32 %v1538_v21, 0.0 }
 0x341   :  { %v1266_v48 = vpop.f32.mrf.mxu2  ;;  %v1325_v5 = vpop.f32.mrf.mxu3 }
 0x342   :  { %v1267_v54 = vadd.f32 %v1266_v48, %v3451_v23  ;;  %v1326_v40 = vadd.f32 %v1325_v5, %v3453_v10 }
 0x344   :  { %v1505_v36 = vadd.f32 %v1417_v42, %v1267_v54  ;;  %v1506_v63 = vadd.f32 %v1476_v62, %v1326_v40 }
 0x346   :  { %v1539_v12 = vadd.f32 %v3464_v0, %v1505_v36  ;;  %v1540_v11 = vadd.f32 %v3466_v6, %v1506_v63  ;;  %v2112_v6 = vld [vmem:[%s3536_s6] ss:$0 sm:$0xff] }
 0x348   :  { %v1567_v15 = vmax.f32 %v1539_v12, 0.0  ;;  %v1568_v59 = vmax.f32 %v1540_v11, 0.0 }
 0x34a   :  { %v1581_v3 = vmax.f32 %v1565_v61, %v1567_v15  ;;  %v1582_v58 = vmax.f32 %v1566_v44, %v1568_v59 }
 0x34c   :  { %v1589_v38 = vmax.f32 %v1581_v3, %v1582_v58 }
 0x34e   :  { %1848 = vmatmul.f32.vlgmr.msra.gmra.mxu2 %v1589_v38 }
 0x371   :  { %v1660_v10 = vpop.f32.mrf.mxu3 }
 0x381   :  { %v1640_v23 = vpop.f32.mrf.mxu2 }
 0x382   :  { %v1661_v56 = vadd.f32 %v1660_v10, %v1640_v23 }
 0x391   :  { %v1697_v52 = vpop.f32.mrf.mxu2 }
 0x392   :  { %v1700_v47 = vadd.f32 %v1697_v52, %v1661_v56 }
 0x3a1   :  { %v1735_v27 = vpop.f32.mrf.mxu3 }
 0x3a2   :  { %v1738_v22 = vadd.f32 %v1735_v27, %v1700_v47 }
 0x3b1   :  { %v1773_v32 = vpop.f32.mrf.mxu2 }
 0x3b2   :  { %v1776_v0 = vadd.f32 %v1773_v32, %v1738_v22 }
 0x3c1   :  { %v1811_v41 = vpop.f32.mrf.mxu3 }
 0x3c2   :  { %v1814_v8 = vadd.f32 %v1811_v41, %v1776_v0 }
 0x3d1   :  { %v1849_v18 = vpop.f32.mrf.mxu2 }
 0x3d2   :  { %v1852_v34 = vadd.f32 %v1849_v18, %v1814_v8 }
 0x3d4   :  { %v1857_v16 = vadd.f32 %v2112_v6, %v1852_v34 }
 0x3d6   :  { %1858 = vst [vmem:[%s3537_s7] sm:$0xff] %v1857_v16 }
 0x3d7   :  { %1863 = vsyncpa [#allocation3], 1 }
 0x3d8   :  { %1864 = vsyncpa [#allocation5], 1 }

</bundles_post_ra>
